<compile_context>
chip_gen: v7x
topology: tpu7x:2x2x1
jax: 0.10.0
libtpu: 0.0.40
codegen_flags: <defaults>
</compile_context>

<pallas_src>
import functools
import math

import jax
import jax.numpy as jnp
from jax import lax
from jax.experimental import pallas as pl
from jax.experimental.pallas import tpu as pltpu

# ---------------- model config (small, BERT-like) ----------------
BATCH = 2
SEQ = 8
HIDDEN = 32
NUM_HEADS = 4
HEAD_DIM = HIDDEN // NUM_HEADS
INTERMEDIATE = 64
LN_EPS = 1e-12

LANE = 128  # padded lane width for activations and weight segments

# vec-slab row layout: one logical vector per row, each starting at lane 0
VEC_BQ, VEC_BK, VEC_BV, VEC_BO, VEC_BI, VEC_B2 = 0, 1, 2, 3, 4, 5
VEC_LN1G, VEC_LN1B, VEC_LN2G, VEC_LN2B = 6, 7, 8, 9
VEC_HEADMASK0 = 10                           # NUM_HEADS rows of per-head lane masks
VEC_ATTNMASK0 = VEC_HEADMASK0 + NUM_HEADS    # BATCH rows of additive attention mask
VEC_ROWS = ((VEC_ATTNMASK0 + BATCH + 7) // 8) * 8


def _gelu_exact(x):
    # HF ACT2FN["gelu"]: exact erf-based GELU (matches the PyTorch reference).
    # TODO(synk): tanh approximation would move this to the EUP slot at real dims.
    return 0.5 * x * (1.0 + lax.erf(x * (1.0 / math.sqrt(2.0))))


def _layer_norm_padded(xp, gamma, beta, n_real, eps):
    # xp's lanes >= n_real are exactly zero and gamma/beta are zero-padded there, so
    # full-width sums equal sums over the real lanes and padded output lanes stay zero.
    inv_n = 1.0 / n_real
    mean = jnp.sum(xp, axis=-1, keepdims=True) * inv_n
    ex2 = jnp.sum(xp * xp, axis=-1, keepdims=True) * inv_n
    var = ex2 - mean * mean
    return (xp - mean) * lax.rsqrt(var + eps) * gamma + beta


def bert_layer_kernel(x_ref, w_ref, vec_ref, out_ref, *,
                      batch, seq, hidden, num_heads):
    # x_ref   : (B*S, 128)     token-flattened, lane-padded hidden states (pads zero)
    # w_ref   : (128, 6*128)   [ Wq | Wk | Wv | Wo | Wi | W2 ], 128-aligned segments
    # vec_ref : (16, 128)      biases / LN params / head masks / attention mask rows
    # out_ref : (B*S, 128)     lane-dense output (real data in lanes [0:H))
    HP = x_ref.shape[1]
    B, S, H, NH = batch, seq, hidden, num_heads
    d = H // NH
    scale = 1.0 / math.sqrt(d)

    x = x_ref[...]                                       # (B*S, HP)

    # ---- fused QKV projection; q / k / v each occupy their own aligned 128-lane
    #      segment, so the result slices below are tile-aligned (no rotates).
    qkv = jnp.dot(x, w_ref[:, 0:3 * HP], preferred_element_type=jnp.float32)
    q = (qkv[:, 0:HP] + vec_ref[VEC_BQ:VEC_BQ + 1, :]).reshape(B, S, HP)
    k = (qkv[:, HP:2 * HP] + vec_ref[VEC_BK:VEC_BK + 1, :]).reshape(B, S, HP)
    v = (qkv[:, 2 * HP:3 * HP] + vec_ref[VEC_BV:VEC_BV + 1, :]).reshape(B, S, HP)

    # additive attention mask: one vec-slab row per batch, lanes [0:S)
    amask = vec_ref[VEC_ATTNMASK0:VEC_ATTNMASK0 + B, 0:S].reshape(B, 1, S)

    # ---- attention: heads stay in their natural lane slots; per-head separation is
    #      done with aligned head-mask rows (VPU multiplies) instead of sub-128-lane
    #      slices, concatenates or transposes.  Contraction over the full (zero-padded)
    #      lane width is mathematically identical to the per-head d-wide contraction.
    ctx = None
    for h in range(NH):                                  # static unroll, NH tiny
        hm = vec_ref[VEC_HEADMASK0 + h:VEC_HEADMASK0 + h + 1, :]      # (1, HP)
        s = jnp.einsum('bqd,bkd->bqk', q * hm, k,
                       preferred_element_type=jnp.float32) * scale + amask
        m = jnp.max(s, axis=-1, keepdims=True)
        e = jnp.exp(s - m)
        p = e / jnp.sum(e, axis=-1, keepdims=True)       # exact softmax (no approx recip)
        c = jnp.einsum('bqk,bkd->bqd', p, v,
                       preferred_element_type=jnp.float32) * hm
        ctx = c if ctx is None else ctx + c
    ctx = ctx.reshape(B * S, HP)                         # pads beyond H stay zero

    # ---- self-output: dense + residual + LayerNorm
    attn = jnp.dot(ctx, w_ref[:, 3 * HP:4 * HP],
                   preferred_element_type=jnp.float32) + vec_ref[VEC_BO:VEC_BO + 1, :]
    h1 = _layer_norm_padded(attn + x,
                            vec_ref[VEC_LN1G:VEC_LN1G + 1, :],
                            vec_ref[VEC_LN1B:VEC_LN1B + 1, :], H, LN_EPS)

    # ---- feed-forward: dense -> GELU -> dense + residual + LayerNorm
    ff = jnp.dot(h1, w_ref[:, 4 * HP:5 * HP],
                 preferred_element_type=jnp.float32) + vec_ref[VEC_BI:VEC_BI + 1, :]
    ff = _gelu_exact(ff)
    ff = jnp.dot(ff, w_ref[:, 5 * HP:6 * HP],
                 preferred_element_type=jnp.float32) + vec_ref[VEC_B2:VEC_B2 + 1, :]
    h2 = _layer_norm_padded(ff + h1,
                            vec_ref[VEC_LN2G:VEC_LN2G + 1, :],
                            vec_ref[VEC_LN2B:VEC_LN2B + 1, :], H, LN_EPS)

    out_ref[...] = h2.astype(out_ref.dtype)              # lane-dense 128-wide store


def elastic_bert_layer(hidden_states, attention_mask, params):
    B, S, H = hidden_states.shape
    d = H // NUM_HEADS

    # ---- activations: tokens flattened and lane-padded to 128 (pads are zero)
    x_pad = jnp.zeros((B * S, LANE), jnp.float32)
    x_pad = x_pad.at[:, :H].set(hidden_states.reshape(B * S, H))

    # ---- packed weight slab: six 128-lane-aligned (128,128) segments
    def _seg(w):
        seg = jnp.zeros((LANE, LANE), jnp.float32)
        return seg.at[:w.shape[0], :w.shape[1]].set(w)

    w_slab = jnp.concatenate(
        [_seg(params["wq"]), _seg(params["wk"]), _seg(params["wv"]),
         _seg(params["wo"]), _seg(params["wi"]), _seg(params["w2"])], axis=1)

    # ---- packed vector slab (one f32 (8,128)-tile pair): biases, LN params,
    #      per-head lane masks and the per-batch additive attention mask.
    vecs = jnp.zeros((VEC_ROWS, LANE), jnp.float32)

    def _put(vs, row, vec1d):
        flat = vec1d.reshape(-1)
        return vs.at[row, :flat.shape[0]].set(flat)

    vecs = _put(vecs, VEC_BQ, params["bq"])
    vecs = _put(vecs, VEC_BK, params["bk"])
    vecs = _put(vecs, VEC_BV, params["bv"])
    vecs = _put(vecs, VEC_BO, params["bo"])
    vecs = _put(vecs, VEC_BI, params["bi"])
    vecs = _put(vecs, VEC_B2, params["b2"])
    vecs = _put(vecs, VEC_LN1G, params["ln1_g"])
    vecs = _put(vecs, VEC_LN1B, params["ln1_b"])
    vecs = _put(vecs, VEC_LN2G, params["ln2_g"])
    vecs = _put(vecs, VEC_LN2B, params["ln2_b"])
    for h in range(NUM_HEADS):
        vecs = vecs.at[VEC_HEADMASK0 + h, h * d:(h + 1) * d].set(1.0)
    vecs = vecs.at[VEC_ATTNMASK0:VEC_ATTNMASK0 + B, :S].set(attention_mask.reshape(B, S))

    kernel = functools.partial(bert_layer_kernel, batch=B, seq=S, hidden=H,
                               num_heads=NUM_HEADS)

    out = pl.pallas_call(
        kernel,
        out_shape=jax.ShapeDtypeStruct((B * S, LANE), hidden_states.dtype),
        grid=(1,),                                   # whole (tiny) layer in one step
        in_specs=[
            pl.BlockSpec((B * S, LANE), lambda i: (0, 0)),       # padded tokens
            pl.BlockSpec(w_slab.shape, lambda i: (0, 0)),        # packed weights
            pl.BlockSpec(vecs.shape, lambda i: (0, 0)),          # packed vectors
        ],
        out_specs=pl.BlockSpec((B * S, LANE), lambda i: (0, 0)),
        compiler_params=pltpu.CompilerParams(
            dimension_semantics=("arbitrary",)),
    )(x_pad, w_slab, vecs)

    return out[:, :H].reshape(B, S, H)


# ---------------- pure-JAX reference (for correctness check) ----------------
def _layer_norm_ref(x, gamma, beta, eps):
    mean = jnp.mean(x, axis=-1, keepdims=True)
    var = jnp.mean(jnp.square(x - mean), axis=-1, keepdims=True)
    return (x - mean) * lax.rsqrt(var + eps) * gamma + beta


def reference_layer(x, mask, p):
    B, S, H = x.shape
    d = H // NUM_HEADS
    q = x @ p["wq"] + p["bq"]
    k = x @ p["wk"] + p["bk"]
    v = x @ p["wv"] + p["bv"]
    qh = q.reshape(B, S, NUM_HEADS, d).transpose(0, 2, 1, 3)
    kh = k.reshape(B, S, NUM_HEADS, d).transpose(0, 2, 1, 3)
    vh = v.reshape(B, S, NUM_HEADS, d).transpose(0, 2, 1, 3)
    scores = jnp.einsum("bhqd,bhkd->bhqk", qh, kh) / math.sqrt(d)
    scores = scores + mask[:, None, :, :]            # (B,1,1,S) broadcast
    probs = jax.nn.softmax(scores, axis=-1)
    ctx = jnp.einsum("bhqk,bhkd->bhqd", probs, vh).transpose(0, 2, 1, 3).reshape(B, S, H)
    attn_out = ctx @ p["wo"] + p["bo"]
    h1 = _layer_norm_ref(attn_out + x, p["ln1_g"], p["ln1_b"], LN_EPS)
    inter = _gelu_exact(h1 @ p["wi"] + p["bi"])
    ffn = inter @ p["w2"] + p["b2"]
    return _layer_norm_ref(ffn + h1, p["ln2_g"], p["ln2_b"], LN_EPS)


def init_params(key):
    ks = jax.random.split(key, 12)
    std = 0.02
    return {
        "wq": jax.random.normal(ks[0], (HIDDEN, HIDDEN), jnp.float32) * std,
        "bq": jax.random.normal(ks[1], (1, HIDDEN), jnp.float32) * std,
        "wk": jax.random.normal(ks[2], (HIDDEN, HIDDEN), jnp.float32) * std,
        "bk": jax.random.normal(ks[3], (1, HIDDEN), jnp.float32) * std,
        "wv": jax.random.normal(ks[4], (HIDDEN, HIDDEN), jnp.float32) * std,
        "bv": jax.random.normal(ks[5], (1, HIDDEN), jnp.float32) * std,
        "wo": jax.random.normal(ks[6], (HIDDEN, HIDDEN), jnp.float32) * std,
        "bo": jax.random.normal(ks[7], (1, HIDDEN), jnp.float32) * std,
        "ln1_g": jnp.ones((1, HIDDEN), jnp.float32),
        "ln1_b": jnp.zeros((1, HIDDEN), jnp.float32),
        "wi": jax.random.normal(ks[8], (HIDDEN, INTERMEDIATE), jnp.float32) * std,
        "bi": jax.random.normal(ks[9], (1, INTERMEDIATE), jnp.float32) * std,
        "w2": jax.random.normal(ks[10], (INTERMEDIATE, HIDDEN), jnp.float32) * std,
        "b2": jax.random.normal(ks[11], (1, HIDDEN), jnp.float32) * std,
        "ln2_g": jnp.ones((1, HIDDEN), jnp.float32),
        "ln2_b": jnp.zeros((1, HIDDEN), jnp.float32),
    }


if __name__ == "__main__":
    key = jax.random.PRNGKey(0)
    k_x, k_m, k_p = jax.random.split(key, 3)

    hidden_states = jax.random.normal(k_x, (BATCH, SEQ, HIDDEN), jnp.float32)
    # additive mask: 0 for attend, -10000 for masked (last 2 positions of batch 1)
    keep = jnp.ones((BATCH, 1, SEQ), jnp.float32)
    keep = keep.at[1, 0, SEQ - 2:].set(0.0)
    attention_mask = (1.0 - keep) * -10000.0

    params = init_params(k_p)

    out = elastic_bert_layer(hidden_states, attention_mask, params)
    out = jax.block_until_ready(out)

    ref = reference_layer(hidden_states, attention_mask, params)
    assert out.shape == (BATCH, SEQ, HIDDEN)
    assert jnp.allclose(out, ref, atol=1e-4, rtol=1e-4), "mismatch vs reference"

    print("KERNEL_OK")
</pallas_src>

<mosaic_0001>
module attributes {stable_mosaic.version = 11 : i64} {
  func.func @bert_layer_kernel(%arg0: i32, %arg1: memref<16x128xf32, #tpu.memory_space<vmem>>, %arg2: memref<128x768xf32, #tpu.memory_space<vmem>>, %arg3: memref<16x128xf32, #tpu.memory_space<vmem>>, %arg4: memref<16x128xf32, #tpu.memory_space<vmem>>) attributes {dimension_semantics = [#tpu.dimension_semantics<arbitrary>], iteration_bounds = array<i64: 1>, scalar_prefetch = 0 : i64, scratch_operands = 0 : i64, tpu.core_type = #tpu.core_type<tc>, window_params = [{pipeline_mode = #tpu.pipeline_mode<synchronous>, transform_indices = @transform_0, window_bounds = array<i64: 16, 128>}, {pipeline_mode = #tpu.pipeline_mode<synchronous>, transform_indices = @transform_1, window_bounds = array<i64: 128, 768>}, {pipeline_mode = #tpu.pipeline_mode<synchronous>, transform_indices = @transform_2, window_bounds = array<i64: 16, 128>}, {pipeline_mode = #tpu.pipeline_mode<synchronous>, transform_indices = @transform_3, window_bounds = array<i64: 16, 128>}]} {
    %c0 = arith.constant 0 : index
    %c0_0 = arith.constant 0 : index
    %0 = vector.load %arg1[%c0, %c0_0] : memref<16x128xf32, #tpu.memory_space<vmem>>, vector<16x128xf32>
    %c0_1 = arith.constant 0 : index
    %c0_2 = arith.constant 0 : index
    %1 = vector.load %arg2[%c0_1, %c0_2] : memref<128x768xf32, #tpu.memory_space<vmem>>, vector<128x384xf32>
    %cst = arith.constant dense<0.000000e+00> : vector<16x384xf32>
    %2 = tpu.matmul %0, %1, %cst {dimension_numbers = #tpu.dot_dimension_numbers<[1], [0], [0], [1], [0, 0, 1, 1], [], []>} : vector<16x128xf32>, vector<128x384xf32>, vector<16x384xf32> -> vector<16x384xf32>
    %3 = vector.extract_strided_slice %2 {offsets = [0, 0], sizes = [16, 128], strides = [1, 1]} : vector<16x384xf32> to vector<16x128xf32>
    %c0_3 = arith.constant 0 : index
    %c0_4 = arith.constant 0 : index
    %4 = vector.load %arg3[%c0_3, %c0_4] : memref<16x128xf32, #tpu.memory_space<vmem>>, vector<1x128xf32>
    %5 = vector.broadcast %4 : vector<1x128xf32> to vector<16x128xf32>
    %6 = arith.addf %3, %5 : vector<16x128xf32>
    %7 = vector.shape_cast %6 : vector<16x128xf32> to vector<2x8x128xf32>
    %8 = vector.extract_strided_slice %2 {offsets = [0, 128], sizes = [16, 128], strides = [1, 1]} : vector<16x384xf32> to vector<16x128xf32>
    %c1 = arith.constant 1 : index
    %c0_5 = arith.constant 0 : index
    %9 = vector.load %arg3[%c1, %c0_5] : memref<16x128xf32, #tpu.memory_space<vmem>>, vector<1x128xf32>
    %10 = vector.broadcast %9 : vector<1x128xf32> to vector<16x128xf32>
    %11 = arith.addf %8, %10 : vector<16x128xf32>
    %12 = vector.shape_cast %11 : vector<16x128xf32> to vector<2x8x128xf32>
    %13 = vector.extract_strided_slice %2 {offsets = [0, 256], sizes = [16, 128], strides = [1, 1]} : vector<16x384xf32> to vector<16x128xf32>
    %c2 = arith.constant 2 : index
    %c0_6 = arith.constant 0 : index
    %14 = vector.load %arg3[%c2, %c0_6] : memref<16x128xf32, #tpu.memory_space<vmem>>, vector<1x128xf32>
    %15 = vector.broadcast %14 : vector<1x128xf32> to vector<16x128xf32>
    %16 = arith.addf %13, %15 : vector<16x128xf32>
    %17 = vector.shape_cast %16 : vector<16x128xf32> to vector<2x8x128xf32>
    %c14 = arith.constant 14 : index
    %c0_7 = arith.constant 0 : index
    %18 = vector.load %arg3[%c14, %c0_7] : memref<16x128xf32, #tpu.memory_space<vmem>>, vector<2x8xf32>
    %19 = vector.shape_cast %18 : vector<2x8xf32> to vector<2x1x8xf32>
    %c10 = arith.constant 10 : index
    %c0_8 = arith.constant 0 : index
    %20 = vector.load %arg3[%c10, %c0_8] : memref<16x128xf32, #tpu.memory_space<vmem>>, vector<1x128xf32>
    %21 = vector.shape_cast %20 : vector<1x128xf32> to vector<1x1x128xf32>
    %22 = vector.broadcast %21 : vector<1x1x128xf32> to vector<2x8x128xf32>
    %23 = arith.mulf %7, %22 : vector<2x8x128xf32>
    "tpu.trace_start"() <{level = 10 : i32, message = "bqd,bkd->bqk"}> : () -> ()
    %cst_9 = arith.constant dense<0.000000e+00> : vector<2x8x8xf32>
    %24 = tpu.matmul %23, %12, %cst_9 {dimension_numbers = #tpu.dot_dimension_numbers<[2], [2], [1], [1], [0, 0, 0, 1, 1, 1], [0], [0]>} : vector<2x8x128xf32>, vector<2x8x128xf32>, vector<2x8x8xf32> -> vector<2x8x8xf32>
    "tpu.trace_stop"() : () -> ()
    %cst_10 = arith.constant 0.353553385 : f32
    %25 = vector.broadcast %cst_10 : f32 to vector<2x8x8xf32>
    %26 = arith.mulf %24, %25 : vector<2x8x8xf32>
    %27 = vector.broadcast %19 : vector<2x1x8xf32> to vector<2x8x8xf32>
    %28 = arith.addf %26, %27 : vector<2x8x8xf32>
    %cst_11 = arith.constant dense<0xFF800000> : vector<2x8xf32>
    %29 = vector.multi_reduction <maximumf>, %28, %cst_11 [2] : vector<2x8x8xf32> to vector<2x8xf32>
    %30 = vector.shape_cast %29 : vector<2x8xf32> to vector<2x8x1xf32>
    %31 = vector.broadcast %30 : vector<2x8x1xf32> to vector<2x8x8xf32>
    %32 = arith.subf %28, %31 : vector<2x8x8xf32>
    %33 = math.exp %32 : vector<2x8x8xf32>
    %cst_12 = arith.constant dense<0.000000e+00> : vector<2x8xf32>
    %34 = vector.multi_reduction <add>, %33, %cst_12 [2] : vector<2x8x8xf32> to vector<2x8xf32>
    %35 = vector.shape_cast %34 : vector<2x8xf32> to vector<2x8x1xf32>
    %36 = vector.broadcast %35 : vector<2x8x1xf32> to vector<2x8x8xf32>
    %37 = arith.divf %33, %36 : vector<2x8x8xf32>
    "tpu.trace_start"() <{level = 10 : i32, message = "bqk,bkd->bqd"}> : () -> ()
    %cst_13 = arith.constant dense<0.000000e+00> : vector<2x8x128xf32>
    %38 = tpu.matmul %37, %17, %cst_13 {dimension_numbers = #tpu.dot_dimension_numbers<[2], [1], [1], [2], [0, 0, 0, 1, 1, 2], [0], [0]>} : vector<2x8x8xf32>, vector<2x8x128xf32>, vector<2x8x128xf32> -> vector<2x8x128xf32>
    "tpu.trace_stop"() : () -> ()
    %39 = vector.shape_cast %20 : vector<1x128xf32> to vector<1x1x128xf32>
    %40 = vector.broadcast %39 : vector<1x1x128xf32> to vector<2x8x128xf32>
    %41 = arith.mulf %38, %40 : vector<2x8x128xf32>
    %c11 = arith.constant 11 : index
    %c0_14 = arith.constant 0 : index
    %42 = vector.load %arg3[%c11, %c0_14] : memref<16x128xf32, #tpu.memory_space<vmem>>, vector<1x128xf32>
    %43 = vector.shape_cast %42 : vector<1x128xf32> to vector<1x1x128xf32>
    %44 = vector.broadcast %43 : vector<1x1x128xf32> to vector<2x8x128xf32>
    %45 = arith.mulf %7, %44 : vector<2x8x128xf32>
    "tpu.trace_start"() <{level = 10 : i32, message = "bqd,bkd->bqk"}> : () -> ()
    %cst_15 = arith.constant dense<0.000000e+00> : vector<2x8x8xf32>
    %46 = tpu.matmul %45, %12, %cst_15 {dimension_numbers = #tpu.dot_dimension_numbers<[2], [2], [1], [1], [0, 0, 0, 1, 1, 1], [0], [0]>} : vector<2x8x128xf32>, vector<2x8x128xf32>, vector<2x8x8xf32> -> vector<2x8x8xf32>
    "tpu.trace_stop"() : () -> ()
    %cst_16 = arith.constant 0.353553385 : f32
    %47 = vector.broadcast %cst_16 : f32 to vector<2x8x8xf32>
    %48 = arith.mulf %46, %47 : vector<2x8x8xf32>
    %49 = vector.broadcast %19 : vector<2x1x8xf32> to vector<2x8x8xf32>
    %50 = arith.addf %48, %49 : vector<2x8x8xf32>
    %cst_17 = arith.constant dense<0xFF800000> : vector<2x8xf32>
    %51 = vector.multi_reduction <maximumf>, %50, %cst_17 [2] : vector<2x8x8xf32> to vector<2x8xf32>
    %52 = vector.shape_cast %51 : vector<2x8xf32> to vector<2x8x1xf32>
    %53 = vector.broadcast %52 : vector<2x8x1xf32> to vector<2x8x8xf32>
    %54 = arith.subf %50, %53 : vector<2x8x8xf32>
    %55 = math.exp %54 : vector<2x8x8xf32>
    %cst_18 = arith.constant dense<0.000000e+00> : vector<2x8xf32>
    %56 = vector.multi_reduction <add>, %55, %cst_18 [2] : vector<2x8x8xf32> to vector<2x8xf32>
    %57 = vector.shape_cast %56 : vector<2x8xf32> to vector<2x8x1xf32>
    %58 = vector.broadcast %57 : vector<2x8x1xf32> to vector<2x8x8xf32>
    %59 = arith.divf %55, %58 : vector<2x8x8xf32>
    "tpu.trace_start"() <{level = 10 : i32, message = "bqk,bkd->bqd"}> : () -> ()
    %cst_19 = arith.constant dense<0.000000e+00> : vector<2x8x128xf32>
    %60 = tpu.matmul %59, %17, %cst_19 {dimension_numbers = #tpu.dot_dimension_numbers<[2], [1], [1], [2], [0, 0, 0, 1, 1, 2], [0], [0]>} : vector<2x8x8xf32>, vector<2x8x128xf32>, vector<2x8x128xf32> -> vector<2x8x128xf32>
    "tpu.trace_stop"() : () -> ()
    %61 = vector.shape_cast %42 : vector<1x128xf32> to vector<1x1x128xf32>
    %62 = vector.broadcast %61 : vector<1x1x128xf32> to vector<2x8x128xf32>
    %63 = arith.mulf %60, %62 : vector<2x8x128xf32>
    %64 = arith.addf %41, %63 : vector<2x8x128xf32>
    %c12 = arith.constant 12 : index
    %c0_20 = arith.constant 0 : index
    %65 = vector.load %arg3[%c12, %c0_20] : memref<16x128xf32, #tpu.memory_space<vmem>>, vector<1x128xf32>
    %66 = vector.shape_cast %65 : vector<1x128xf32> to vector<1x1x128xf32>
    %67 = vector.broadcast %66 : vector<1x1x128xf32> to vector<2x8x128xf32>
    %68 = arith.mulf %7, %67 : vector<2x8x128xf32>
    "tpu.trace_start"() <{level = 10 : i32, message = "bqd,bkd->bqk"}> : () -> ()
    %cst_21 = arith.constant dense<0.000000e+00> : vector<2x8x8xf32>
    %69 = tpu.matmul %68, %12, %cst_21 {dimension_numbers = #tpu.dot_dimension_numbers<[2], [2], [1], [1], [0, 0, 0, 1, 1, 1], [0], [0]>} : vector<2x8x128xf32>, vector<2x8x128xf32>, vector<2x8x8xf32> -> vector<2x8x8xf32>
    "tpu.trace_stop"() : () -> ()
    %cst_22 = arith.constant 0.353553385 : f32
    %70 = vector.broadcast %cst_22 : f32 to vector<2x8x8xf32>
    %71 = arith.mulf %69, %70 : vector<2x8x8xf32>
    %72 = vector.broadcast %19 : vector<2x1x8xf32> to vector<2x8x8xf32>
    %73 = arith.addf %71, %72 : vector<2x8x8xf32>
    %cst_23 = arith.constant dense<0xFF800000> : vector<2x8xf32>
    %74 = vector.multi_reduction <maximumf>, %73, %cst_23 [2] : vector<2x8x8xf32> to vector<2x8xf32>
    %75 = vector.shape_cast %74 : vector<2x8xf32> to vector<2x8x1xf32>
    %76 = vector.broadcast %75 : vector<2x8x1xf32> to vector<2x8x8xf32>
    %77 = arith.subf %73, %76 : vector<2x8x8xf32>
    %78 = math.exp %77 : vector<2x8x8xf32>
    %cst_24 = arith.constant dense<0.000000e+00> : vector<2x8xf32>
    %79 = vector.multi_reduction <add>, %78, %cst_24 [2] : vector<2x8x8xf32> to vector<2x8xf32>
    %80 = vector.shape_cast %79 : vector<2x8xf32> to vector<2x8x1xf32>
    %81 = vector.broadcast %80 : vector<2x8x1xf32> to vector<2x8x8xf32>
    %82 = arith.divf %78, %81 : vector<2x8x8xf32>
    "tpu.trace_start"() <{level = 10 : i32, message = "bqk,bkd->bqd"}> : () -> ()
    %cst_25 = arith.constant dense<0.000000e+00> : vector<2x8x128xf32>
    %83 = tpu.matmul %82, %17, %cst_25 {dimension_numbers = #tpu.dot_dimension_numbers<[2], [1], [1], [2], [0, 0, 0, 1, 1, 2], [0], [0]>} : vector<2x8x8xf32>, vector<2x8x128xf32>, vector<2x8x128xf32> -> vector<2x8x128xf32>
    "tpu.trace_stop"() : () -> ()
    %84 = vector.shape_cast %65 : vector<1x128xf32> to vector<1x1x128xf32>
    %85 = vector.broadcast %84 : vector<1x1x128xf32> to vector<2x8x128xf32>
    %86 = arith.mulf %83, %85 : vector<2x8x128xf32>
    %87 = arith.addf %64, %86 : vector<2x8x128xf32>
    %c13 = arith.constant 13 : index
    %c0_26 = arith.constant 0 : index
    %88 = vector.load %arg3[%c13, %c0_26] : memref<16x128xf32, #tpu.memory_space<vmem>>, vector<1x128xf32>
    %89 = vector.shape_cast %88 : vector<1x128xf32> to vector<1x1x128xf32>
    %90 = vector.broadcast %89 : vector<1x1x128xf32> to vector<2x8x128xf32>
    %91 = arith.mulf %7, %90 : vector<2x8x128xf32>
    "tpu.trace_start"() <{level = 10 : i32, message = "bqd,bkd->bqk"}> : () -> ()
    %cst_27 = arith.constant dense<0.000000e+00> : vector<2x8x8xf32>
    %92 = tpu.matmul %91, %12, %cst_27 {dimension_numbers = #tpu.dot_dimension_numbers<[2], [2], [1], [1], [0, 0, 0, 1, 1, 1], [0], [0]>} : vector<2x8x128xf32>, vector<2x8x128xf32>, vector<2x8x8xf32> -> vector<2x8x8xf32>
    "tpu.trace_stop"() : () -> ()
    %cst_28 = arith.constant 0.353553385 : f32
    %93 = vector.broadcast %cst_28 : f32 to vector<2x8x8xf32>
    %94 = arith.mulf %92, %93 : vector<2x8x8xf32>
    %95 = vector.broadcast %19 : vector<2x1x8xf32> to vector<2x8x8xf32>
    %96 = arith.addf %94, %95 : vector<2x8x8xf32>
    %cst_29 = arith.constant dense<0xFF800000> : vector<2x8xf32>
    %97 = vector.multi_reduction <maximumf>, %96, %cst_29 [2] : vector<2x8x8xf32> to vector<2x8xf32>
    %98 = vector.shape_cast %97 : vector<2x8xf32> to vector<2x8x1xf32>
    %99 = vector.broadcast %98 : vector<2x8x1xf32> to vector<2x8x8xf32>
    %100 = arith.subf %96, %99 : vector<2x8x8xf32>
    %101 = math.exp %100 : vector<2x8x8xf32>
    %cst_30 = arith.constant dense<0.000000e+00> : vector<2x8xf32>
    %102 = vector.multi_reduction <add>, %101, %cst_30 [2] : vector<2x8x8xf32> to vector<2x8xf32>
    %103 = vector.shape_cast %102 : vector<2x8xf32> to vector<2x8x1xf32>
    %104 = vector.broadcast %103 : vector<2x8x1xf32> to vector<2x8x8xf32>
    %105 = arith.divf %101, %104 : vector<2x8x8xf32>
    "tpu.trace_start"() <{level = 10 : i32, message = "bqk,bkd->bqd"}> : () -> ()
    %cst_31 = arith.constant dense<0.000000e+00> : vector<2x8x128xf32>
    %106 = tpu.matmul %105, %17, %cst_31 {dimension_numbers = #tpu.dot_dimension_numbers<[2], [1], [1], [2], [0, 0, 0, 1, 1, 2], [0], [0]>} : vector<2x8x8xf32>, vector<2x8x128xf32>, vector<2x8x128xf32> -> vector<2x8x128xf32>
    "tpu.trace_stop"() : () -> ()
    %107 = vector.shape_cast %88 : vector<1x128xf32> to vector<1x1x128xf32>
    %108 = vector.broadcast %107 : vector<1x1x128xf32> to vector<2x8x128xf32>
    %109 = arith.mulf %106, %108 : vector<2x8x128xf32>
    %110 = arith.addf %87, %109 : vector<2x8x128xf32>
    %111 = vector.shape_cast %110 : vector<2x8x128xf32> to vector<16x128xf32>
    %c0_32 = arith.constant 0 : index
    %c384 = arith.constant 384 : index
    %112 = vector.load %arg2[%c0_32, %c384] : memref<128x768xf32, #tpu.memory_space<vmem>>, vector<128x128xf32>
    %cst_33 = arith.constant dense<0.000000e+00> : vector<16x128xf32>
    %113 = tpu.matmul %111, %112, %cst_33 {dimension_numbers = #tpu.dot_dimension_numbers<[1], [0], [0], [1], [0, 0, 1, 1], [], []>} : vector<16x128xf32>, vector<128x128xf32>, vector<16x128xf32> -> vector<16x128xf32>
    %c3 = arith.constant 3 : index
    %c0_34 = arith.constant 0 : index
    %114 = vector.load %arg3[%c3, %c0_34] : memref<16x128xf32, #tpu.memory_space<vmem>>, vector<1x128xf32>
    %115 = vector.broadcast %114 : vector<1x128xf32> to vector<16x128xf32>
    %116 = arith.addf %113, %115 : vector<16x128xf32>
    %117 = arith.addf %116, %0 : vector<16x128xf32>
    %c6 = arith.constant 6 : index
    %c0_35 = arith.constant 0 : index
    %118 = vector.load %arg3[%c6, %c0_35] : memref<16x128xf32, #tpu.memory_space<vmem>>, vector<1x128xf32>
    %c7 = arith.constant 7 : index
    %c0_36 = arith.constant 0 : index
    %119 = vector.load %arg3[%c7, %c0_36] : memref<16x128xf32, #tpu.memory_space<vmem>>, vector<1x128xf32>
    %cst_37 = arith.constant dense<0.000000e+00> : vector<16xf32>
    %120 = vector.multi_reduction <add>, %117, %cst_37 [1] : vector<16x128xf32> to vector<16xf32>
    %121 = vector.shape_cast %120 : vector<16xf32> to vector<16x1xf32>
    %cst_38 = arith.constant 3.125000e-02 : f32
    %122 = vector.broadcast %cst_38 : f32 to vector<16x1xf32>
    %123 = arith.mulf %121, %122 : vector<16x1xf32>
    %124 = arith.mulf %117, %117 : vector<16x128xf32>
    %cst_39 = arith.constant dense<0.000000e+00> : vector<16xf32>
    %125 = vector.multi_reduction <add>, %124, %cst_39 [1] : vector<16x128xf32> to vector<16xf32>
    %126 = vector.shape_cast %125 : vector<16xf32> to vector<16x1xf32>
    %cst_40 = arith.constant 3.125000e-02 : f32
    %127 = vector.broadcast %cst_40 : f32 to vector<16x1xf32>
    %128 = arith.mulf %126, %127 : vector<16x1xf32>
    %129 = arith.mulf %123, %123 : vector<16x1xf32>
    %130 = arith.subf %128, %129 : vector<16x1xf32>
    %131 = vector.broadcast %123 : vector<16x1xf32> to vector<16x128xf32>
    %132 = arith.subf %117, %131 : vector<16x128xf32>
    %cst_41 = arith.constant 9.99999996E-13 : f32
    %133 = vector.broadcast %cst_41 : f32 to vector<16x1xf32>
    %134 = arith.addf %130, %133 : vector<16x1xf32>
    %135 = math.rsqrt %134 : vector<16x1xf32>
    %136 = vector.broadcast %135 : vector<16x1xf32> to vector<16x128xf32>
    %137 = arith.mulf %132, %136 : vector<16x128xf32>
    %138 = vector.broadcast %118 : vector<1x128xf32> to vector<16x128xf32>
    %139 = arith.mulf %137, %138 : vector<16x128xf32>
    %140 = vector.broadcast %119 : vector<1x128xf32> to vector<16x128xf32>
    %141 = arith.addf %139, %140 : vector<16x128xf32>
    %c0_42 = arith.constant 0 : index
    %c512 = arith.constant 512 : index
    %142 = vector.load %arg2[%c0_42, %c512] : memref<128x768xf32, #tpu.memory_space<vmem>>, vector<128x128xf32>
    %cst_43 = arith.constant dense<0.000000e+00> : vector<16x128xf32>
    %143 = tpu.matmul %141, %142, %cst_43 {dimension_numbers = #tpu.dot_dimension_numbers<[1], [0], [0], [1], [0, 0, 1, 1], [], []>} : vector<16x128xf32>, vector<128x128xf32>, vector<16x128xf32> -> vector<16x128xf32>
    %c4 = arith.constant 4 : index
    %c0_44 = arith.constant 0 : index
    %144 = vector.load %arg3[%c4, %c0_44] : memref<16x128xf32, #tpu.memory_space<vmem>>, vector<1x128xf32>
    %145 = vector.broadcast %144 : vector<1x128xf32> to vector<16x128xf32>
    %146 = arith.addf %143, %145 : vector<16x128xf32>
    %cst_45 = arith.constant 5.000000e-01 : f32
    %147 = vector.broadcast %cst_45 : f32 to vector<16x128xf32>
    %148 = arith.mulf %147, %146 : vector<16x128xf32>
    %cst_46 = arith.constant 0.707106769 : f32
    %149 = vector.broadcast %cst_46 : f32 to vector<16x128xf32>
    %150 = arith.mulf %146, %149 : vector<16x128xf32>
    %151 = math.erf %150 : vector<16x128xf32>
    %cst_47 = arith.constant 1.000000e+00 : f32
    %152 = vector.broadcast %cst_47 : f32 to vector<16x128xf32>
    %153 = arith.addf %152, %151 : vector<16x128xf32>
    %154 = arith.mulf %148, %153 : vector<16x128xf32>
    %c0_48 = arith.constant 0 : index
    %c640 = arith.constant 640 : index
    %155 = vector.load %arg2[%c0_48, %c640] : memref<128x768xf32, #tpu.memory_space<vmem>>, vector<128x128xf32>
    %cst_49 = arith.constant dense<0.000000e+00> : vector<16x128xf32>
    %156 = tpu.matmul %154, %155, %cst_49 {dimension_numbers = #tpu.dot_dimension_numbers<[1], [0], [0], [1], [0, 0, 1, 1], [], []>} : vector<16x128xf32>, vector<128x128xf32>, vector<16x128xf32> -> vector<16x128xf32>
    %c5 = arith.constant 5 : index
    %c0_50 = arith.constant 0 : index
    %157 = vector.load %arg3[%c5, %c0_50] : memref<16x128xf32, #tpu.memory_space<vmem>>, vector<1x128xf32>
    %158 = vector.broadcast %157 : vector<1x128xf32> to vector<16x128xf32>
    %159 = arith.addf %156, %158 : vector<16x128xf32>
    %160 = arith.addf %159, %141 : vector<16x128xf32>
    %c8 = arith.constant 8 : index
    %c0_51 = arith.constant 0 : index
    %161 = vector.load %arg3[%c8, %c0_51] : memref<16x128xf32, #tpu.memory_space<vmem>>, vector<1x128xf32>
    %c9 = arith.constant 9 : index
    %c0_52 = arith.constant 0 : index
    %162 = vector.load %arg3[%c9, %c0_52] : memref<16x128xf32, #tpu.memory_space<vmem>>, vector<1x128xf32>
    %cst_53 = arith.constant dense<0.000000e+00> : vector<16xf32>
    %163 = vector.multi_reduction <add>, %160, %cst_53 [1] : vector<16x128xf32> to vector<16xf32>
    %164 = vector.shape_cast %163 : vector<16xf32> to vector<16x1xf32>
    %cst_54 = arith.constant 3.125000e-02 : f32
    %165 = vector.broadcast %cst_54 : f32 to vector<16x1xf32>
    %166 = arith.mulf %164, %165 : vector<16x1xf32>
    %167 = arith.mulf %160, %160 : vector<16x128xf32>
    %cst_55 = arith.constant dense<0.000000e+00> : vector<16xf32>
    %168 = vector.multi_reduction <add>, %167, %cst_55 [1] : vector<16x128xf32> to vector<16xf32>
    %169 = vector.shape_cast %168 : vector<16xf32> to vector<16x1xf32>
    %cst_56 = arith.constant 3.125000e-02 : f32
    %170 = vector.broadcast %cst_56 : f32 to vector<16x1xf32>
    %171 = arith.mulf %169, %170 : vector<16x1xf32>
    %172 = arith.mulf %166, %166 : vector<16x1xf32>
    %173 = arith.subf %171, %172 : vector<16x1xf32>
    %174 = vector.broadcast %166 : vector<16x1xf32> to vector<16x128xf32>
    %175 = arith.subf %160, %174 : vector<16x128xf32>
    %cst_57 = arith.constant 9.99999996E-13 : f32
    %176 = vector.broadcast %cst_57 : f32 to vector<16x1xf32>
    %177 = arith.addf %173, %176 : vector<16x1xf32>
    %178 = math.rsqrt %177 : vector<16x1xf32>
    %179 = vector.broadcast %178 : vector<16x1xf32> to vector<16x128xf32>
    %180 = arith.mulf %175, %179 : vector<16x128xf32>
    %181 = vector.broadcast %161 : vector<1x128xf32> to vector<16x128xf32>
    %182 = arith.mulf %180, %181 : vector<16x128xf32>
    %183 = vector.broadcast %162 : vector<1x128xf32> to vector<16x128xf32>
    %184 = arith.addf %182, %183 : vector<16x128xf32>
    %c0_58 = arith.constant 0 : index
    %c0_59 = arith.constant 0 : index
    %185 = vector.load %arg4[%c0_58, %c0_59] : memref<16x128xf32, #tpu.memory_space<vmem>>, vector<16x128xf32>
    tpu.vector_store %arg4[%c0_58, %c0_59], %184 {strides = array<i32>} : memref<16x128xf32, #tpu.memory_space<vmem>>, vector<16x128xf32>,
    return
  }
  func.func @transform_0(%arg0: i32) -> (i32, i32) {
    %c0_i32 = arith.constant 0 : i32
    %c0_i32_0 = arith.constant 0 : i32
    %c0_i32_1 = arith.constant 0 : i32
    return %c0_i32, %c0_i32_0 : i32, i32
  }
  func.func @transform_1(%arg0: i32) -> (i32, i32) {
    %c0_i32 = arith.constant 0 : i32
    %c0_i32_0 = arith.constant 0 : i32
    %c0_i32_1 = arith.constant 0 : i32
    return %c0_i32, %c0_i32_0 : i32, i32
  }
  func.func @transform_2(%arg0: i32) -> (i32, i32) {
    %c0_i32 = arith.constant 0 : i32
    %c0_i32_0 = arith.constant 0 : i32
    %c0_i32_1 = arith.constant 0 : i32
    return %c0_i32, %c0_i32_0 : i32, i32
  }
  func.func @transform_3(%arg0: i32) -> (i32, i32) {
    %c0_i32 = arith.constant 0 : i32
    %c0_i32_0 = arith.constant 0 : i32
    %c0_i32_1 = arith.constant 0 : i32
    return %c0_i32, %c0_i32_0 : i32, i32
  }
}

</mosaic_0001>

<bundles_post_ra>
// kernel: tpu_custom_call.1
= control target key start
LH: loop header
LB: loop body
LE: loop exit
PB: predicated region body
PF: predicated region fallthrough
CT: control target
= control target key end

     0   :  { %8 = vsyncpa [#allocation3], 0  ;;  %s2924_s0 = inlined_call_operand.hbm [shape: f32[16,128], index: 0, kind: input, shape index: {}]   ;;  %s2925_s1 = inlined_call_operand.hbm [shape: f32[128,768], index: 1, kind: input, shape index: {}]   ;;  %s2926_s2 = inlined_call_operand.hbm [shape: f32[16,128], index: 2, kind: input, shape index: {}]   ;;  %s2927_s3 = inlined_call_operand.hbm [shape: f32[16,128], index: 3, kind: output, shape index: {}]  }
   0x1   :  { %9 = vsyncpa [#allocation6], 0 }
   0x2   :  { %10 = vsyncpa [#allocation4], 0  ;;  %s2662_s12 = smov [#allocation5]   ;;  %s2568_s16 = scalar_lea.hbm %s2925_s1, 12288 }
   0x3   :  { %s28_s13 = sshll.u32 %s2662_s12, 4  ;;  %p2569_p0 = scmp.ne.s32.totalorder %s2925_s1, %s2568_s16  ;;  %s29_s13 = int_to_ptr.vmem [resolvable:$true] %s28_s13 }
   0x4   :  { %p2572_p1 = scmp.lt.u32.totalorder %s2568_s16, %s2925_s1 }
   0x6   :  { %p2574_p2 = pnand %p2572_p1, %p2569_p0 }
   0x8   :  { %2577 = shalt.err (!%p2574_p2)
}
   0x9   :  { %s2578_s21 = scalar_lea.vmem %s29_s13, 12288  ;;  %p2583_p4 = scmp.lt.s32.totalorder %s29_s13, %s29_s13 }
   0xa   :  { %p2579_p3 = scmp.ne.s32.totalorder %s29_s13, %s2578_s21  ;;  %p2584_p5 = scmp.lt.s32.totalorder %s2578_s21, %s2578_s21 }
   0xc   :  { %p2585_p6 = por %p2584_p5, %p2583_p4 }
   0xe   :  { %p2586_p7 = pnand %p2585_p6, %p2579_p3 }
  0x10   :  { %2589 = shalt.err (!%p2586_p7)
}
  0x11   :  { %s2663_s22 = smov 768   ;;  %s2664_s23 = smov 48  }
  0x12   :  { %34 = dma.hbm_to_vmem [thread:$0]  %s2925_s1, 12288, %s29_s13, [#allocation6], %s2663_s22, %s2663_s22, %s2664_s23  }
  0x13   :  { %s2665_s26 = smov [#allocation2]   ;;  %s2590_s30 = scalar_lea.hbm %s2924_s0, 256 }
  0x14   :  { %s16_s27 = sshll.u32 %s2665_s26, 4  ;;  %p2591_p8 = scmp.ne.s32.totalorder %s2924_s0, %s2590_s30  ;;  %s17_s27 = int_to_ptr.vmem [resolvable:$true] %s16_s27 }
  0x15   :  { %p2594_p9 = scmp.lt.u32.totalorder %s2590_s30, %s2924_s0 }
  0x17   :  { %p2596_p10 = pnand %p2594_p9, %p2591_p8 }
  0x19   :  { %2599 = shalt.err (!%p2596_p10)
}
  0x1a   :  { %s2600_s8 = scalar_lea.vmem %s17_s27, 256  ;;  %p2605_p12 = scmp.lt.s32.totalorder %s17_s27, %s17_s27 }
  0x1b   :  { %p2601_p11 = scmp.ne.s32.totalorder %s17_s27, %s2600_s8  ;;  %p2606_p13 = scmp.lt.s32.totalorder %s2600_s8, %s2600_s8 }
  0x1d   :  { %p2607_p0 = por %p2606_p13, %p2605_p12 }
  0x1f   :  { %p2608_p1 = pnand %p2607_p0, %p2601_p11 }
  0x21   :  { %2611 = shalt.err (!%p2608_p1)
}
  0x22   :  { %s2666_s1 = smov 128   ;;  %s2667_s9 = smov 8  }
  0x23   :  { %22 = dma.hbm_to_vmem [thread:$0]  %s2924_s0, 256, %s17_s27, [#allocation3], %s2666_s1, %s2666_s1, %s2667_s9  }
  0x24   :  { %s2668_s12 = smov [#allocation7]   ;;  %s2612_s16 = scalar_lea.hbm %s2926_s2, 256 }
  0x25   :  { %s40_s13 = sshll.u32 %s2668_s12, 4  ;;  %p2613_p2 = scmp.ne.s32.totalorder %s2926_s2, %s2612_s16  ;;  %s41_s13 = int_to_ptr.vmem [resolvable:$true] %s40_s13 }
  0x26   :  { %p2616_p3 = scmp.lt.u32.totalorder %s2612_s16, %s2926_s2 }
  0x28   :  { %p2618_p4 = pnand %p2616_p3, %p2613_p2 }
  0x2a   :  { %2621 = shalt.err (!%p2618_p4)
}
  0x2b   :  { %s2622_s21 = scalar_lea.vmem %s41_s13, 256  ;;  %p2627_p6 = scmp.lt.s32.totalorder %s41_s13, %s41_s13 }
  0x2c   :  { %p2623_p5 = scmp.ne.s32.totalorder %s41_s13, %s2622_s21  ;;  %p2628_p7 = scmp.lt.s32.totalorder %s2622_s21, %s2622_s21 }
  0x2e   :  { %p2629_p8 = por %p2628_p7, %p2627_p6 }
  0x30   :  { %p2630_p9 = pnand %p2629_p8, %p2623_p5 }
  0x32   :  { %2633 = shalt.err (!%p2630_p9)
}
  0x33   :  { %46 = dma.hbm_to_vmem [thread:$0]  %s2926_s2, 256, %s41_s13, [#allocation6], %s2666_s1, %s2666_s1, %s2667_s9  }
  0x34   :  { %2656 = dma.done.wait [#allocation3], 256  }
  0x35   :  { %2657 = vsyncadd [#allocation3], 4294967040 }
  0x36   :  { %2658 = dma.done.wait [#allocation6], 12544  }
  0x37   :  { %2659 = vsyncadd [#allocation6], 4294954752  ;;  %v2669_v0 = vmov 0.0   ;;  %v59_v1 = vld [vmem:[#allocation5 + $0x8] sm:$0xff]  ;;  %v62_v2 = vld [vmem:[#allocation5 + $0x38] sm:$0xff]  ;;  %vm2670_vm0 = vmmov 0  }
  0x38   :  { %170 = vmatprep.mubr.f32.mxu0 %v2669_v0  ;;  %v58_v3 = vld [vmem:[#allocation5] sm:$0xff]  ;;  %v2353_v4 = vpack.c.bf16 %v62_v2, %v59_v1  ;;  %v61_v5 = vld [vmem:[#allocation5 + $0x30] sm:$0xff]  ;;  %v65_v6 = vld [vmem:[#allocation5 + $0x68] sm:$0xff]  ;;  %vm464_vm1 = vcmask 64512   ;;  %s2672_s2 = smov [#allocation8]  }
  0x39   :  { %v68_v7 = vld [vmem:[#allocation5 + $0x98] sm:$0xff]  ;;  %v2355_v8 = vpack.c.bf16 %v61_v5, %v58_v3  ;;  %v64_v10 = vld [vmem:[#allocation5 + $0x60] sm:$0xff]  ;;  %v67_v11 = vld [vmem:[#allocation5 + $0x90] sm:$0xff]  ;;  %s1993_s23 = sshll.u32 %s2672_s2, 4  ;;  %s1994_s23 = int_to_ptr.vmem [resolvable:$true] %s1993_s23 }
  0x3a   :  { %v2357_v9 = vpack.c.bf16 %v68_v7, %v65_v6  ;;  %v71_v12 = vld [vmem:[#allocation5 + $0xc8] sm:$0xff]  ;;  %2354 = vmatprep.subr.bf16.mxu0 %v2353_v4  ;;  %v74_v13 = vld [vmem:[#allocation5 + $0xf8] sm:$0xff]  ;;  %v2359_v14 = vpack.c.bf16 %v67_v11, %v64_v10  ;;  %v70_v16 = vld [vmem:[#allocation5 + $0xc0] sm:$0xff]  ;;  %s2634_s24 = scalar_lea.vmem %s1994_s23, 256  ;;  %p2639_p11 = scmp.lt.s32.totalorder %s1994_s23, %s1994_s23 }
  0x3b   :  { %2356 = vmatpush1.bf16.msra.mxu0 %v2355_v8  ;;  %v2361_v15 = vpack.c.bf16 %v74_v13, %v71_v12  ;;  %v73_v17 = vld [vmem:[#allocation5 + $0xf0] sm:$0xff]  ;;  %v77_v18 = vld [vmem:[#allocation5 + $0x128] sm:$0xff]  ;;  %v80_v19 = vld [vmem:[#allocation5 + $0x158] sm:$0xff]  ;;  %p2635_p10 = scmp.ne.s32.totalorder %s1994_s23, %s2634_s24  ;;  %p2640_p12 = scmp.lt.s32.totalorder %s2634_s24, %s2634_s24 }
  0x3c   :  { %2358 = vmatprep.subr.bf16.mxu0 %v2357_v9  ;;  %v2363_v20 = vpack.c.bf16 %v73_v17, %v70_v16  ;;  %v2365_v21 = vpack.c.bf16 %v80_v19, %v77_v18  ;;  %v76_v22 = vld [vmem:[#allocation5 + $0x120] sm:$0xff]  ;;  %v79_v23 = vld [vmem:[#allocation5 + $0x150] sm:$0xff]  ;;  %v83_v24 = vld [vmem:[#allocation5 + $0x188] sm:$0xff] }
  0x3d   :  { %v86_v25 = vld [vmem:[#allocation5 + $0x1b8] sm:$0xff]  ;;  %v2736_v26 = vld [vmem:[#allocation2] sm:$0xff]  ;;  %v2367_v27 = vpack.c.bf16 %v79_v23, %v76_v22  ;;  %v82_v29 = vld [vmem:[#allocation5 + $0x180] sm:$0xff]  ;;  %p2641_p13 = por %p2640_p12, %p2639_p11 }
  0x3e   :  { %2165 = vmatprep.mubr.f32.mxu1 %v2736_v26  ;;  %v2369_v28 = vpack.c.bf16 %v86_v25, %v83_v24  ;;  %v85_v30 = vld [vmem:[#allocation5 + $0x1b0] sm:$0xff]  ;;  %v89_v31 = vld [vmem:[#allocation5 + $0x1e8] sm:$0xff]  ;;  %v92_v32 = vld [vmem:[#allocation5 + $0x218] sm:$0xff]  ;;  %v2671_v25 = vmov 1966171168  }
  0x3f   :  { %2360 = vmatpush1.bf16.msra.mxu0 %v2359_v14  ;;  %v2371_v33 = vpack.c.bf16 %v85_v30, %v82_v29  ;;  %v2373_v34 = vpack.c.bf16 %v92_v32, %v89_v31  ;;  %v88_v35 = vld [vmem:[#allocation5 + $0x1e0] sm:$0xff]  ;;  %v91_v36 = vld [vmem:[#allocation5 + $0x210] sm:$0xff]  ;;  %v95_v37 = vld [vmem:[#allocation5 + $0x248] sm:$0xff]  ;;  %p2642_p0 = pnand %p2641_p13, %p2635_p10 }
  0x40   :  { %2362 = vmatprep.subr.bf16.mxu0 %v2361_v15  ;;  %v98_v38 = vld [vmem:[#allocation5 + $0x278] sm:$0xff]  ;;  %v2375_v39 = vpack.c.bf16 %v91_v36, %v88_v35  ;;  %v94_v41 = vld [vmem:[#allocation5 + $0x240] sm:$0xff]  ;;  %v97_v42 = vld [vmem:[#allocation5 + $0x270] sm:$0xff] }
  0x41   :  { %v2377_v40 = vpack.c.bf16 %v98_v38, %v95_v37  ;;  %v101_v43 = vld [vmem:[#allocation5 + $0x2a8] sm:$0xff]  ;;  %v104_v44 = vld [vmem:[#allocation5 + $0x2d8] sm:$0xff]  ;;  %v2379_v45 = vpack.c.bf16 %v97_v42, %v94_v41  ;;  %v100_v47 = vld [vmem:[#allocation5 + $0x2a0] sm:$0xff] }
  0x42   :  { %v2381_v46 = vpack.c.bf16 %v104_v44, %v101_v43  ;;  %v103_v48 = vld [vmem:[#allocation5 + $0x2d0] sm:$0xff]  ;;  %v2742_v50 = vld [vmem:[#allocation2 + $0x8] sm:$0xff]  ;;  %v2006_v51 = vld [vmem:[#allocation7] ss:$0 sm:$0xff] }
  0x43   :  { %2364 = vmatpush1.bf16.msra.mxu0 %v2363_v20  ;;  %v2383_v49 = vpack.c.bf16 %v103_v48, %v100_v47  ;;  %v2007_v52 = vld [vmem:[#allocation7 + $0x1] ss:$0 sm:$0xff]  ;;  %v2749_v56 = vld [vmem:[#allocation7 + $0xa] ss:$0 sm:$0xff]  ;;  %v60_v1 = vld [vmem:[#allocation5 + $0x10] sm:$0xff] }
  0x44   :  { %2366 = vmatprep.subr.bf16.mxu0 %v2365_v21  ;;  %v63_v2 = vld [vmem:[#allocation5 + $0x40] sm:$0xff]  ;;  %v66_v3 = vld [vmem:[#allocation5 + $0x70] sm:$0xff]  ;;  %v2009_v32 = vld.sshfl [vmem:[#allocation7 + $0xe] sm:$0x11 pattern:$0x75316420] }
  0x45   :  { %v2385_v4 = vpack.c.bf16 %v63_v2, %v60_v1  ;;  %v69_v5 = vld [vmem:[#allocation5 + $0xa0] sm:$0xff]  ;;  %v72_v7 = vld [vmem:[#allocation5 + $0xd0] sm:$0xff] }
  0x46   :  { %v2389_v6 = vpack.c.bf16 %v69_v5, %v66_v3  ;;  %v75_v8 = vld [vmem:[#allocation5 + $0x100] sm:$0xff]  ;;  %v78_v10 = vld [vmem:[#allocation5 + $0x130] sm:$0xff] }
  0x47   :  { %2368 = vmatpush1.bf16.msra.mxu0 %v2367_v27  ;;  %2386 = vmatprep.subr.bf16.mxu1 %v2385_v4  ;;  %v2393_v9 = vpack.c.bf16 %v75_v8, %v72_v7  ;;  %v81_v11 = vld [vmem:[#allocation5 + $0x160] sm:$0xff]  ;;  %v84_v13 = vld [vmem:[#allocation5 + $0x190] sm:$0xff]  ;;  %v290_v27 = vunpack.c.l.s4 %v2671_v25 }
  0x48   :  { %2370 = vmatprep.subr.bf16.mxu0 %v2369_v28  ;;  %2388 = vmatpush3.bf16.msra.mxu1 %v2385_v4  ;;  %v2397_v12 = vpack.c.bf16 %v81_v11, %v78_v10  ;;  %v87_v14 = vld [vmem:[#allocation5 + $0x1c0] sm:$0xff]  ;;  %v90_v16 = vld [vmem:[#allocation5 + $0x1f0] sm:$0xff]  ;;  %v292_v28 = vlaneseq }
  0x49   :  { %2390 = vmatprep.subr.bf16.mxu1 %v2389_v6  ;;  %v2401_v15 = vpack.c.bf16 %v87_v14, %v84_v13  ;;  %v93_v17 = vld [vmem:[#allocation5 + $0x220] sm:$0xff]  ;;  %v96_v19 = vld [vmem:[#allocation5 + $0x250] sm:$0xff]  ;;  %v291_v29 = vunpack.c.0.s8 %v290_v27  ;;  %v2799_v13 = vld [vmem:[#allocation7 + $0xb] ss:$0 sm:$0xff] }
  0x4a   :  { %v2405_v18 = vpack.c.bf16 %v93_v17, %v90_v16  ;;  %v99_v20 = vld [vmem:[#allocation5 + $0x280] sm:$0xff]  ;;  %v102_v22 = vld [vmem:[#allocation5 + $0x2b0] sm:$0xff]  ;;  %v293_v30 = vshrl.u32 %v292_v28, 7 }
  0x4b   :  { %2372 = vmatpush1.bf16.msra.mxu0 %v2371_v33  ;;  %v2409_v21 = vpack.c.bf16 %v99_v20, %v96_v19  ;;  %v105_v23 = vld [vmem:[#allocation5 + $0x2e0] sm:$0xff]  ;;  %v288_v33 = vcombine.high %v2009_v32, %v2009_v32 }
  0x4c   :  { %2374 = vmatprep.subr.bf16.mxu0 %v2373_v34  ;;  %2392 = vmatpush3.bf16.msra.mxu1 %v2389_v6  ;;  %v2413_v24 = vpack.c.bf16 %v105_v23, %v102_v22  ;;  %v294_v31 = vsub.s32 %v291_v29, %v293_v30  ;;  %v454_v35 = vsub.s32 0, %v293_v30  ;;  %v2008_v3 = vld [vmem:[#allocation7 + $0x2] ss:$0 sm:$0xff] }
  0x4d   :  { %2394 = vmatprep.subr.bf16.mxu1 %v2393_v9 }
  0x4e   :  { %v295_v34 = vrot.slane %v2009_v32, %v294_v31  ;;  %v302_v37 = vrot.slane %v288_v33, %v294_v31 }
  0x4f   :  { %2376 = vmatpush1.bf16.msra.mxu0 %v2375_v39 }
  0x50   :  { %2378 = vmatprep.subr.bf16.mxu0 %v2377_v40  ;;  %2396 = vmatpush3.bf16.msra.mxu1 %v2393_v9  ;;  %v2773_v36 = vrot.slane %v295_v34, %v454_v35  ;;  %v2776_v42 = vrot.slane %v302_v37, %v454_v35 }
  0x51   :  { %2398 = vmatprep.subr.bf16.mxu1 %v2397_v12 }
  0x53   :  { %2380 = vmatpush1.bf16.msra.mxu0 %v2379_v45 }
  0x54   :  { %2382 = vmatprep.subr.bf16.mxu0 %v2381_v46  ;;  %2400 = vmatpush3.bf16.msra.mxu1 %v2397_v12 }
  0x55   :  { %2402 = vmatprep.subr.bf16.mxu1 %v2401_v15 }
  0x57   :  { %2384 = vmatpush1.bf16.msra.mxu0 %v2383_v49 }
  0x58   :  { %2168 = vmatprep.subr.mxu0 %v2669_v0  ;;  %2404 = vmatpush3.bf16.msra.mxu1 %v2401_v15 }
  0x59   :  { %2406 = vmatprep.subr.bf16.mxu1 %v2405_v18 }
  0x5a   :  { %171 = vmatmul.mubr.f32.vlgmr.msra.gmra.mrb[0].mxu0 %v2736_v26 }
  0x5b   :  { %176 = vmatprep.mubr.f32.mxu0 %v2669_v0 }
  0x5c   :  { %2408 = vmatpush3.bf16.msra.mxu1 %v2405_v18 }
  0x5d   :  { %2410 = vmatprep.subr.bf16.mxu1 %v2409_v21 }
  0x5e   :  { %177 = vmatmul.mubr.f32.gmra.mrb[2].mxu0 %v2742_v50 }
  0x5f   :  { %2170 = vmatprep.mubr.msk.f32.mxu0 %vm2670_vm0, %v2669_v0 }
  0x60   :  { %2412 = vmatpush3.bf16.msra.mxu1 %v2409_v21 }
  0x61   :  { %2414 = vmatprep.subr.bf16.mxu1 %v2413_v24 }
  0x64   :  { %2416 = vmatpush3.bf16.msra.mxu1 %v2413_v24 }
  0x65   :  { %2198 = vmatprep.subr.mxu1 %v2669_v0 }
  0x67   :  { %2166 = vmatmul.mubr.f32.vlgmr.msra.gmra.mrb[0].mxu1 %v2742_v50 }
  0x68   :  { %2200 = vmatprep.mubr.msk.f32.mxu1 %vm2670_vm0, %v2669_v0 }
 0x12d   :  { %v172_v53 = vpop.f32.mrb[0].mxu0 }
 0x12e   :  { %v2747_v54 = vadd.f32 %v2006_v51, %v172_v53  ;;  %v174_v55 = vpop.f32.mrb[1].mxu0 }
 0x12f   :  { %v2751_v57 = vadd.f32 %v2007_v52, %v174_v55 }
 0x130   :  { %v308_v59 = vmul.f32 %v2749_v56, %v2747_v54  ;;  %v640_v14 = vmul.f32 %v2799_v13, %v2747_v54 }
 0x131   :  { %v178_v58 = vpop.f32.mrb[2].mxu0  ;;  %2169 = vmatpush3.xpose.msra.mxu0 %v2751_v57 }
 0x132   :  { %v2756_v60 = vadd.f32 %v2006_v51, %v178_v58  ;;  %v180_v61 = vpop.f32.mrb[3].mxu0  ;;  %2173 = vmatprep.subr.mxu0 %v2669_v0 }
 0x133   :  { %v2759_v62 = vadd.f32 %v2007_v52, %v180_v61 }
 0x134   :  { %2171 = vmatmul.mubr.f32.vlgmr.msra.gmra.mrb[4].mxu0 %v308_v59  ;;  %v309_v63 = vmul.f32 %v2749_v56, %v2756_v60  ;;  %v641_v15 = vmul.f32 %v2799_v13, %v2756_v60 }
 0x135   :  { %2174 = vmatpush3.xpose.msra.mxu0 %v2759_v62  ;;  %2175 = vmatprep.mubr.msk.f32.mxu0 %vm2670_vm0, %v2669_v0 }
 0x136   :  { %2178 = vmatprep.subr.mxu0 %v2669_v0 }
 0x138   :  { %2176 = vmatmul.mubr.f32.vlgmr.msra.gmra.mrb[6].mxu0 %v309_v63 }
 0x139   :  { %2180 = vmatprep.mubr.msk.f32.mxu0 %vm2670_vm0, %v2669_v0 }
 0x13a   :  { %v2167_v2 = vpop.f32.mrb[0].mxu1 }
 0x13b   :  { %v249_v4 = vpop.f32.mrb[1].mxu1  ;;  %v2783_v5 = vadd.f32 %v2167_v2, %v2008_v3 }
 0x13c   :  { %v2785_v6 = vadd.f32 %v2008_v3, %v249_v4 }
 0x13e   :  { %2179 = vmatpush3.msra.mxu0 %v2785_v6  ;;  %2199 = vmatpush3.msra.mxu1 %v2785_v6 }
 0x13f   :  { %2183 = vmatprep.subr.mxu0 %v2669_v0  ;;  %2208 = vmatprep.subr.mxu1 %v2669_v0 }
 0x207   :  { %v376_v38 = vpop.f32.mrb[4].mxu0 }
 0x208   :  { %v450_v39 = vmul.f32 0.35355338, %v376_v38  ;;  %v2172_v40 = vpop.f32.mrb[5].mxu0 }
 0x20a   :  { %v462_v41 = vadd.f32 %v2773_v36, %v450_v39 }
 0x20b   :  { %v446_v43 = vpop.f32.mrb[6].mxu0 }
 0x20c   :  { %v451_v44 = vmul.f32 0.35355338, %v446_v43  ;;  %v465_v45 = vsel %vm464_vm1, %v462_v41, -inf  ;;  %v2177_v46 = vpop.f32.mrb[7].mxu0 }
 0x20d   :  { %466 = vmax.xlane.f32.xlu0 %v465_v45 }
 0x20e   :  { %v463_v47 = vadd.f32 %v2776_v42, %v451_v44 }
 0x210   :  { %v468_v48 = vsel %vm464_vm1, %v463_v47, -inf }
 0x211   :  { %469 = vmax.xlane.f32.xlu0 %v468_v48 }
 0x29a   :  { %v467_v49 = vpop.xlane.xlu0 %466 }
 0x29b   :  { %v471_v51 = vsub.f32 %v462_v41, %v467_v49 }
 0x29d   :  { %v473_v52 = vmul.f32 1.442695, %v471_v51 }
 0x29e   :  { %v470_v53 = vpop.xlane.xlu0 %469 }
 0x29f   :  { %2524 = vpow2.f32 %v473_v52  ;;  %v472_v55 = vsub.f32 %v463_v47, %v470_v53  ;;  %v2821_v47 = vld [vmem:[#allocation7 + $0xc] ss:$0 sm:$0xff] }
 0x2a0   :  { %v963_v51 = vmul.f32 %v2821_v47, %v2747_v54  ;;  %v964_v52 = vmul.f32 %v2821_v47, %v2756_v60 }
 0x2a1   :  { %v475_v58 = vmul.f32 1.442695, %v472_v55 }
 0x2a3   :  { %2526 = vpow2.f32 %v475_v58 }
 0x2a9   :  { %v2525_v59 = vpop.eup %2524 }
 0x2aa   :  { %v477_v61 = vsel %vm464_vm1, %v2525_v59, 0.0 }
 0x2ab   :  { %478 = vadd.xlane.f32.xlu1 %v477_v61 }
 0x2ad   :  { %v2527_v63 = vpop.eup %2526 }
 0x2ae   :  { %v480_v1 = vsel %vm464_vm1, %v2527_v63, 0.0 }
 0x2af   :  { %481 = vadd.xlane.f32.xlu1 %v480_v1 }
 0x338   :  { %v479_v7 = vpop.xlane.xlu1 %478 }
 0x339   :  { %2528 = vrcp.f32 %v479_v7 }
 0x33c   :  { %v482_v8 = vpop.xlane.xlu1 %481 }
 0x33d   :  { %2530 = vrcp.f32 %v482_v8 }
 0x343   :  { %v2529_v9 = vpop.eup %2528 }
 0x344   :  { %v484_v10 = vmul.f32 %v2529_v9, %v2525_v59 }
 0x346   :  { %2181 = vmatmul.mubr.msk.f32.vlgmr.msra.gmra.mrb[8].mxu0 %vm464_vm1, %v484_v10 }
 0x347   :  { %v2531_v11 = vpop.eup %2530  ;;  %2184 = vmatpush3.msra.mxu0 %v2783_v5  ;;  %2185 = vmatprep.mubr.msk.f32.mxu0 %vm2670_vm0, %v2669_v0 }
 0x348   :  { %v486_v12 = vmul.f32 %v2531_v11, %v2527_v63  ;;  %2188 = vmatprep.subr.mxu0 %v2669_v0 }
 0x34a   :  { %2186 = vmatmul.mubr.msk.f32.vlgmr.msra.gmra.mrb[10].mxu0 %vm464_vm1, %v486_v12 }
 0x34b   :  { %2190 = vmatprep.mubr.msk.f32.mxu0 %vm2670_vm0, %v2669_v0 }
 0x34e   :  { %2189 = vmatpush3.xpose.msra.mxu0 %v2751_v57 }
 0x34f   :  { %2193 = vmatprep.subr.mxu0 %v2669_v0 }
 0x351   :  { %2191 = vmatmul.mubr.f32.vlgmr.msra.gmra.mrb[12].mxu0 %v640_v14 }
 0x352   :  { %2194 = vmatpush3.xpose.msra.mxu0 %v2759_v62  ;;  %2195 = vmatprep.mubr.msk.f32.mxu0 %vm2670_vm0, %v2669_v0 }
 0x353   :  { %2203 = vmatprep.subr.mxu0 %v2669_v0 }
 0x355   :  { %2196 = vmatmul.mubr.f32.vlgmr.msra.gmra.mrb[14].mxu0 %v641_v15 }
 0x356   :  { %2204 = vmatpush3.msra.mxu0 %v2783_v5  ;;  %2205 = vmatprep.mubr.msk.f32.mxu0 %vm2670_vm0, %v2669_v0 }
 0x357   :  { %2213 = vmatprep.subr.mxu0 %v2669_v0 }
 0x419   :  { %v556_v16 = vpop.f32.mrb[8].mxu0 }
 0x41a   :  { %v2182_v17 = vpop.f32.mrb[9].mxu0  ;;  %v633_v55 = vmul.f32 %v2749_v56, %v556_v16 }
 0x41d   :  { %v629_v18 = vpop.f32.mrb[10].mxu0 }
 0x41e   :  { %v2187_v19 = vpop.f32.mrb[11].mxu0  ;;  %v634_v2 = vmul.f32 %v2749_v56, %v629_v18 }
 0x424   :  { %v708_v20 = vpop.f32.mrb[12].mxu0 }
 0x425   :  { %v782_v21 = vmul.f32 0.35355338, %v708_v20  ;;  %v2192_v22 = vpop.f32.mrb[13].mxu0 }
 0x427   :  { %v784_v23 = vadd.f32 %v782_v21, %v2773_v36 }
 0x428   :  { %v778_v24 = vpop.f32.mrb[14].mxu0 }
 0x429   :  { %v783_v25 = vmul.f32 0.35355338, %v778_v24  ;;  %v2197_v27 = vpop.f32.mrb[15].mxu0  ;;  %v786_v28 = vsel %vm464_vm1, %v784_v23, -inf }
 0x42a   :  { %787 = vmax.xlane.f32.xlu0 %v786_v28 }
 0x42b   :  { %v785_v29 = vadd.f32 %v783_v25, %v2776_v42 }
 0x42d   :  { %v789_v30 = vsel %vm464_vm1, %v785_v29, -inf }
 0x42e   :  { %790 = vmax.xlane.f32.xlu1 %v789_v30 }
 0x4b7   :  { %v788_v31 = vpop.xlane.xlu0 %787 }
 0x4b8   :  { %v792_v32 = vsub.f32 %v784_v23, %v788_v31  ;;  %v2855_v31 = vld [vmem:[#allocation7 + $0xd] ss:$0 sm:$0xff] }
 0x4ba   :  { %v794_v33 = vmul.f32 1.442695, %v792_v32 }
 0x4bb   :  { %v791_v34 = vpop.xlane.xlu1 %790 }
 0x4bc   :  { %2532 = vpow2.f32 %v794_v33  ;;  %v793_v35 = vsub.f32 %v785_v29, %v791_v34  ;;  %v1286_v34 = vmul.f32 %v2855_v31, %v2747_v54 }
 0x4be   :  { %v796_v37 = vmul.f32 1.442695, %v793_v35 }
 0x4c0   :  { %2534 = vpow2.f32 %v796_v37 }
 0x4c6   :  { %v2533_v38 = vpop.eup %2532 }
 0x4c7   :  { %v798_v39 = vsel %vm464_vm1, %v2533_v38, 0.0 }
 0x4c8   :  { %799 = vadd.xlane.f32.xlu0 %v798_v39 }
 0x4ca   :  { %v2535_v40 = vpop.eup %2534 }
 0x4cb   :  { %v801_v41 = vsel %vm464_vm1, %v2535_v40, 0.0 }
 0x4cc   :  { %802 = vadd.xlane.f32.xlu1 %v801_v41 }
 0x555   :  { %v800_v43 = vpop.xlane.xlu0 %799 }
 0x556   :  { %2536 = vrcp.f32 %v800_v43 }
 0x559   :  { %v803_v44 = vpop.xlane.xlu1 %802 }
 0x55a   :  { %2538 = vrcp.f32 %v803_v44 }
 0x560   :  { %v2537_v45 = vpop.eup %2536 }
 0x561   :  { %v805_v46 = vmul.f32 %v2537_v45, %v2533_v38 }
 0x563   :  { %2201 = vmatmul.mubr.msk.f32.vlgmr.msra.gmra.mrb[2].mxu1 %vm464_vm1, %v805_v46 }
 0x564   :  { %v2539_v48 = vpop.eup %2538  ;;  %2209 = vmatpush3.xpose.msra.mxu1 %v2751_v57  ;;  %2210 = vmatprep.mubr.msk.f32.mxu1 %vm2670_vm0, %v2669_v0 }
 0x565   :  { %v807_v49 = vmul.f32 %v2539_v48, %v2535_v40  ;;  %2218 = vmatprep.subr.mxu1 %v2669_v0 }
 0x567   :  { %2206 = vmatmul.mubr.msk.f32.vlgmr.msra.gmra.mrb[16].mxu0 %vm464_vm1, %v807_v49  ;;  %2211 = vmatmul.mubr.f32.vlgmr.msra.gmra.mrb[4].mxu1 %v963_v51 }
 0x568   :  { %2214 = vmatpush3.xpose.msra.mxu0 %v2759_v62  ;;  %2219 = vmatpush3.msra.mxu1 %v2785_v6 }
 0x569   :  { %2215 = vmatprep.mubr.msk.f32.mxu0 %vm2670_vm0, %v2669_v0  ;;  %2223 = vmatprep.subr.mxu0 %v2669_v0 }
 0x56a   :  { %2220 = vmatprep.mubr.msk.f32.mxu1 %vm2670_vm0, %v2669_v0  ;;  %2228 = vmatprep.subr.mxu1 %v2669_v0 }
 0x56b   :  { %2216 = vmatmul.mubr.f32.vlgmr.msra.gmra.mrb[18].mxu0 %v964_v52 }
 0x56c   :  { %2224 = vmatpush3.msra.mxu0 %v2783_v5  ;;  %2225 = vmatprep.mubr.msk.f32.mxu0 %vm2670_vm0, %v2669_v0 }
 0x56d   :  { %2233 = vmatprep.subr.mxu0 %v2669_v0 }
 0x636   :  { %v877_v53 = vpop.f32.mrb[2].mxu1 }
 0x637   :  { %v954_v58 = vmul.f32 %v2799_v13, %v877_v53  ;;  %v2202_v59 = vpop.f32.mrb[3].mxu1 }
 0x639   :  { %v956_v61 = vadd.f32 %v954_v58, %v633_v55 }
 0x63a   :  { %v950_v63 = vpop.f32.mrb[16].mxu0  ;;  %v1031_v1 = vpop.f32.mrb[4].mxu1 }
 0x63b   :  { %v955_v3 = vmul.f32 %v2799_v13, %v950_v63  ;;  %v1105_v4 = vmul.f32 0.35355338, %v1031_v1  ;;  %v2207_v7 = vpop.f32.mrb[17].mxu0  ;;  %v2212_v8 = vpop.f32.mrb[5].mxu1  ;;  %v1605_v1 = vld [vmem:[#allocation5 + $0x48] sm:$0xff] }
 0x63c   :  { %v1606_v7 = vld [vmem:[#allocation5 + $0x78] sm:$0xff]  ;;  %v1607_v8 = vld [vmem:[#allocation5 + $0xa8] sm:$0xff] }
 0x63d   :  { %v957_v9 = vadd.f32 %v955_v3, %v634_v2  ;;  %v1107_v10 = vadd.f32 %v1105_v4, %v2773_v36 }
 0x63e   :  { %v1101_v11 = vpop.f32.mrb[18].mxu0 }
 0x63f   :  { %v1106_v12 = vmul.f32 0.35355338, %v1101_v11  ;;  %v2217_v14 = vpop.f32.mrb[19].mxu0  ;;  %v1109_v15 = vsel %vm464_vm1, %v1107_v10, -inf  ;;  %v2421_v11 = vpack.c.bf16 %v1607_v8, %v1606_v7  ;;  %v1757_v7 = vld [vmem:[#allocation5 + $0x2f0] sm:$0xff] }
 0x640   :  { %1110 = vmax.xlane.f32.xlu0 %v1109_v15  ;;  %v1609_v14 = vld [vmem:[#allocation5 + $0x108] sm:$0xff] }
 0x641   :  { %v1108_v16 = vadd.f32 %v1106_v12, %v2776_v42  ;;  %v1608_v12 = vld [vmem:[#allocation5 + $0xd8] sm:$0xff] }
 0x643   :  { %v1112_v17 = vsel %vm464_vm1, %v1108_v16, -inf }
 0x644   :  { %1113 = vmax.xlane.f32.xlu1 %v1112_v17  ;;  %v2425_v17 = vpack.c.bf16 %v1609_v14, %v1608_v12  ;;  %v1851_v14 = vld [vmem:[#allocation5 + $0xb8] sm:$0xff] }
 0x6cd   :  { %v1111_v56 = vpop.xlane.xlu0 %1110 }
 0x6ce   :  { %v1115_v18 = vsub.f32 %v1107_v10, %v1111_v56  ;;  %v1610_v56 = vld [vmem:[#allocation5 + $0x138] sm:$0xff] }
 0x6d0   :  { %v1117_v13 = vmul.f32 1.442695, %v1115_v18  ;;  %v1611_v18 = vld [vmem:[#allocation5 + $0x168] sm:$0xff] }
 0x6d1   :  { %v1114_v19 = vpop.xlane.xlu1 %1113 }
 0x6d2   :  { %2540 = vpow2.f32 %v1117_v13  ;;  %v1116_v20 = vsub.f32 %v1108_v16, %v1114_v19  ;;  %v2429_v13 = vpack.c.bf16 %v1611_v18, %v1610_v56  ;;  %v1612_v19 = vld [vmem:[#allocation5 + $0x198] sm:$0xff] }
 0x6d4   :  { %v1119_v21 = vmul.f32 1.442695, %v1116_v20  ;;  %v1613_v20 = vld [vmem:[#allocation5 + $0x1c8] sm:$0xff] }
 0x6d6   :  { %2542 = vpow2.f32 %v1119_v21  ;;  %v2433_v21 = vpack.c.bf16 %v1613_v20, %v1612_v19 }
 0x6dc   :  { %v2541_v22 = vpop.eup %2540 }
 0x6dd   :  { %v1121_v23 = vsel %vm464_vm1, %v2541_v22, 0.0 }
 0x6de   :  { %1122 = vadd.xlane.f32.xlu0 %v1121_v23  ;;  %v1615_v23 = vld [vmem:[#allocation5 + $0x228] sm:$0xff] }
 0x6e0   :  { %v2543_v24 = vpop.eup %2542 }
 0x6e1   :  { %v1124_v25 = vsel %vm464_vm1, %v2543_v24, 0.0 }
 0x6e2   :  { %1125 = vadd.xlane.f32.xlu1 %v1124_v25  ;;  %v1616_v25 = vld [vmem:[#allocation5 + $0x258] sm:$0xff] }
 0x76b   :  { %v1123_v27 = vpop.xlane.xlu0 %1122 }
 0x76c   :  { %2544 = vrcp.f32 %v1123_v27  ;;  %v1617_v27 = vld [vmem:[#allocation5 + $0x288] sm:$0xff] }
 0x76f   :  { %v1126_v28 = vpop.xlane.xlu1 %1125 }
 0x770   :  { %2546 = vrcp.f32 %v1126_v28  ;;  %v2441_v28 = vpack.c.bf16 %v1617_v27, %v1616_v25 }
 0x776   :  { %v2545_v29 = vpop.eup %2544 }
 0x777   :  { %v1128_v30 = vmul.f32 %v2545_v29, %v2541_v22  ;;  %v1614_v22 = vld [vmem:[#allocation5 + $0x1f8] sm:$0xff] }
 0x778   :  { %v1618_v29 = vld [vmem:[#allocation5 + $0x2b8] sm:$0xff] }
 0x779   :  { %2221 = vmatmul.mubr.msk.f32.vlgmr.msra.gmra.mrb[6].mxu1 %vm464_vm1, %v1128_v30  ;;  %v1619_v30 = vld [vmem:[#allocation5 + $0x2e8] sm:$0xff] }
 0x77a   :  { %v2547_v32 = vpop.eup %2546  ;;  %2229 = vmatpush3.xpose.msra.mxu1 %v2751_v57  ;;  %2230 = vmatprep.mubr.msk.f32.mxu1 %vm2670_vm0, %v2669_v0  ;;  %v1287_v57 = vmul.f32 %v2855_v31, %v2756_v60 }
 0x77b   :  { %v1130_v33 = vmul.f32 %v2547_v32, %v2543_v24  ;;  %2238 = vmatprep.subr.mxu1 %v2669_v0  ;;  %v2437_v24 = vpack.c.bf16 %v1615_v23, %v1614_v22  ;;  %v2445_v32 = vpack.c.bf16 %v1619_v30, %v1618_v29 }
 0x77d   :  { %2226 = vmatmul.mubr.msk.f32.vlgmr.msra.gmra.mrb[20].mxu0 %vm464_vm1, %v1130_v33  ;;  %2231 = vmatmul.mubr.f32.vlgmr.msra.gmra.mrb[8].mxu1 %v1286_v34 }
 0x77e   :  { %2234 = vmatpush3.xpose.msra.mxu0 %v2759_v62  ;;  %2239 = vmatpush3.msra.mxu1 %v2785_v6 }
 0x77f   :  { %2235 = vmatprep.mubr.msk.f32.mxu0 %vm2670_vm0, %v2669_v0  ;;  %2243 = vmatprep.subr.mxu0 %v2669_v0 }
 0x780   :  { %2240 = vmatprep.mubr.msk.f32.mxu1 %vm2670_vm0, %v2669_v0 }
 0x781   :  { %2236 = vmatmul.mubr.f32.vlgmr.msra.gmra.mrb[22].mxu0 %v1287_v57 }
 0x782   :  { %2244 = vmatpush3.msra.mxu0 %v2783_v5  ;;  %2245 = vmatprep.mubr.msk.f32.mxu0 %vm2670_vm0, %v2669_v0 }
 0x84c   :  { %v1200_v54 = vpop.f32.mrb[6].mxu1 }
 0x84d   :  { %v1277_v62 = vmul.f32 %v2821_v47, %v1200_v54  ;;  %v2222_v6 = vpop.f32.mrb[7].mxu1 }
 0x84f   :  { %v2878_v35 = vadd.f32 %v1277_v62, %v956_v61 }
 0x850   :  { %v1273_v37 = vpop.f32.mrb[20].mxu0  ;;  %v1354_v38 = vpop.f32.mrb[8].mxu1 }
 0x851   :  { %v1278_v39 = vmul.f32 %v2821_v47, %v1273_v37  ;;  %v1428_v60 = vmul.f32 0.35355338, %v1354_v38  ;;  %v2227_v40 = vpop.f32.mrb[21].mxu0  ;;  %v2232_v41 = vpop.f32.mrb[9].mxu1 }
 0x852   :  { %v2022_v41 = vld [vmem:[#allocation7 + $0x3] ss:$0 sm:$0xff] }
 0x853   :  { %v2881_v43 = vadd.f32 %v1278_v39, %v957_v9  ;;  %v1430_v5 = vadd.f32 %v1428_v60, %v2773_v36  ;;  %v1742_v39 = vld [vmem:[#allocation5 + $0x20] sm:$0xff]  ;;  %v1743_v60 = vld [vmem:[#allocation5 + $0x50] sm:$0xff] }
 0x854   :  { %v1424_v44 = vpop.f32.mrb[22].mxu0  ;;  %v2449_v40 = vpack.c.bf16 %v1743_v60, %v1742_v39 }
 0x855   :  { %v1429_v45 = vmul.f32 0.35355338, %v1424_v44  ;;  %v2237_v0 = vpop.f32.mrb[23].mxu0  ;;  %v1432_v46 = vsel %vm464_vm1, %v1430_v5, -inf }
 0x856   :  { %1433 = vmax.xlane.f32.xlu0 %v1432_v46  ;;  %2450 = vmatprep.subr.bf16.mxu0 %v2449_v40 }
 0x857   :  { %v1431_v48 = vadd.f32 %v1429_v45, %v2776_v42  ;;  %v1604_v42 = vld [vmem:[#allocation5 + $0x18] sm:$0xff] }
 0x858   :  { %v2417_v2 = vpack.c.bf16 %v1605_v1, %v1604_v42  ;;  %v1754_v1 = vld [vmem:[#allocation5 + $0x260] sm:$0xff] }
 0x859   :  { %v1435_v49 = vsel %vm464_vm1, %v1431_v48, -inf }
 0x85a   :  { %1436 = vmax.xlane.f32.xlu1 %v1435_v49  ;;  %2418 = vmatprep.subr.bf16.mxu1 %v2417_v2  ;;  %v1745_v49 = vld [vmem:[#allocation5 + $0xb0] sm:$0xff] }
 0x8e3   :  { %v1434_v51 = vpop.xlane.xlu0 %1433 }
 0x8e4   :  { %v1438_v47 = vsub.f32 %v1430_v5, %v1434_v51 }
 0x8e6   :  { %v1440_v52 = vmul.f32 1.442695, %v1438_v47 }
 0x8e7   :  { %v1437_v53 = vpop.xlane.xlu1 %1436 }
 0x8e8   :  { %2548 = vpow2.f32 %v1440_v52  ;;  %v1439_v55 = vsub.f32 %v1431_v48, %v1437_v53  ;;  %v1744_v48 = vld [vmem:[#allocation5 + $0x80] sm:$0xff]  ;;  %v1749_v53 = vld [vmem:[#allocation5 + $0x170] sm:$0xff] }
 0x8e9   :  { %v2453_v51 = vpack.c.bf16 %v1745_v49, %v1744_v48  ;;  %v1748_v52 = vld [vmem:[#allocation5 + $0x140] sm:$0xff]  ;;  %v1860_v49 = vld [vmem:[#allocation5 + $0x268] sm:$0xff] }
 0x8ea   :  { %v1442_v58 = vmul.f32 1.442695, %v1439_v55  ;;  %v2461_v55 = vpack.c.bf16 %v1749_v53, %v1748_v52  ;;  %v2025_v53 = vld [vmem:[#allocation7 + $0x4] ss:$0 sm:$0xff] }
 0x8ec   :  { %2550 = vpow2.f32 %v1442_v58  ;;  %v1750_v58 = vld [vmem:[#allocation5 + $0x1a0] sm:$0xff] }
 0x8f2   :  { %v2549_v36 = vpop.eup %2548 }
 0x8f3   :  { %v1444_v59 = vsel %vm464_vm1, %v2549_v36, 0.0 }
 0x8f4   :  { %1445 = vadd.xlane.f32.xlu0 %v1444_v59  ;;  %v1752_v59 = vld [vmem:[#allocation5 + $0x200] sm:$0xff] }
 0x8f6   :  { %v2551_v61 = vpop.eup %2550 }
 0x8f7   :  { %v1447_v63 = vsel %vm464_vm1, %v2551_v61, 0.0 }
 0x8f8   :  { %1448 = vadd.xlane.f32.xlu1 %v1447_v63  ;;  %v1753_v63 = vld [vmem:[#allocation5 + $0x230] sm:$0xff] }
 0x8f9   :  { %v2469_v42 = vpack.c.bf16 %v1753_v63, %v1752_v59 }
 0x981   :  { %v1446_v3 = vpop.xlane.xlu0 %1445 }
 0x982   :  { %2552 = vrcp.f32 %v1446_v3 }
 0x985   :  { %v1449_v4 = vpop.xlane.xlu1 %1448 }
 0x986   :  { %2554 = vrcp.f32 %v1449_v4  ;;  %v1756_v4 = vld [vmem:[#allocation5 + $0x2c0] sm:$0xff] }
 0x987   :  { %v2477_v8 = vpack.c.bf16 %v1757_v7, %v1756_v4 }
 0x98c   :  { %v2553_v9 = vpop.eup %2552 }
 0x98d   :  { %v1451_v10 = vmul.f32 %v2553_v9, %v2549_v36  ;;  %v1751_v36 = vld [vmem:[#allocation5 + $0x1d0] sm:$0xff]  ;;  %v1848_v9 = vld [vmem:[#allocation5 + $0x28] sm:$0xff] }
 0x98f   :  { %2241 = vmatmul.mubr.msk.f32.vlgmr.msra.gmra.mrb[10].mxu1 %vm464_vm1, %v1451_v10  ;;  %v1849_v10 = vld [vmem:[#allocation5 + $0x58] sm:$0xff] }
 0x990   :  { %v2555_v15 = vpop.eup %2554  ;;  %2420 = vmatpush3.bf16.msra.mxu1 %v2417_v2  ;;  %v1755_v2 = vld [vmem:[#allocation5 + $0x290] sm:$0xff]  ;;  %v2481_v12 = vpack.c.bf16 %v1849_v10, %v1848_v9  ;;  %v2026_v10 = vld [vmem:[#allocation7 + $0x5] ss:$0 sm:$0xff] }
 0x991   :  { %v1453_v16 = vmul.f32 %v2555_v15, %v2551_v61  ;;  %2422 = vmatprep.subr.bf16.mxu1 %v2421_v11  ;;  %v2465_v61 = vpack.c.bf16 %v1751_v36, %v1750_v58  ;;  %v2473_v3 = vpack.c.bf16 %v1755_v2, %v1754_v1 }
 0x993   :  { %2246 = vmatmul.mubr.msk.f32.vlgmr.msra.gmra.mrb[24].mxu0 %vm464_vm1, %v1453_v16  ;;  %v1852_v16 = vld [vmem:[#allocation5 + $0xe8] sm:$0xff] }
 0x994   :  { %2424 = vmatpush3.bf16.msra.mxu1 %v2421_v11  ;;  %2452 = vmatpush3.bf16.msra.mxu0 %v2449_v40  ;;  %v1850_v11 = vld [vmem:[#allocation5 + $0x88] sm:$0xff] }
 0x995   :  { %2426 = vmatprep.subr.bf16.mxu1 %v2425_v17  ;;  %2454 = vmatprep.subr.bf16.mxu0 %v2453_v51  ;;  %v2485_v15 = vpack.c.bf16 %v1851_v14, %v1850_v11 }
 0x998   :  { %2428 = vmatpush3.bf16.msra.mxu1 %v2425_v17  ;;  %2456 = vmatpush3.bf16.msra.mxu0 %v2453_v51  ;;  %v1853_v17 = vld [vmem:[#allocation5 + $0x118] sm:$0xff] }
 0x999   :  { %2430 = vmatprep.subr.bf16.mxu1 %v2429_v13  ;;  %v2489_v56 = vpack.c.bf16 %v1853_v17, %v1852_v16  ;;  %v1861_v51 = vld [vmem:[#allocation5 + $0x298] sm:$0xff] }
 0x99c   :  { %2432 = vmatpush3.bf16.msra.mxu1 %v2429_v13 }
 0x99d   :  { %2434 = vmatprep.subr.bf16.mxu1 %v2433_v21 }
 0x9a0   :  { %2436 = vmatpush3.bf16.msra.mxu1 %v2433_v21 }
 0x9a1   :  { %2438 = vmatprep.subr.bf16.mxu1 %v2437_v24 }
 0x9a4   :  { %2440 = vmatpush3.bf16.msra.mxu1 %v2437_v24 }
 0x9a5   :  { %2442 = vmatprep.subr.bf16.mxu1 %v2441_v28 }
 0x9a8   :  { %2444 = vmatpush3.bf16.msra.mxu1 %v2441_v28 }
 0x9a9   :  { %2446 = vmatprep.subr.bf16.mxu1 %v2445_v32 }
 0x9ac   :  { %2448 = vmatpush3.bf16.msra.mxu1 %v2445_v32 }
 0x9ad   :  { %2482 = vmatprep.subr.bf16.mxu1 %v2481_v12 }
 0xa62   :  { %v1523_v33 = vpop.f32.mrb[10].mxu1 }
 0xa63   :  { %v1600_v34 = vmul.f32 %v2855_v31, %v1523_v33  ;;  %v2242_v57 = vpop.f32.mrb[11].mxu1 }
 0xa65   :  { %v1602_v54 = vadd.f32 %v1600_v34, %v2878_v35 }
 0xa66   :  { %v1596_v62 = vpop.f32.mrb[24].mxu0 }
 0xa67   :  { %v1601_v6 = vmul.f32 %v2855_v31, %v1596_v62  ;;  %v2247_v37 = vpop.f32.mrb[25].mxu0  ;;  %2280 = vmatprep.mubr.f32.mxu1 %v1602_v54  ;;  %v2023_v54 = vld [vmem:[#allocation7 + $0x6] ss:$0 sm:$0xff] }
 0xa69   :  { %v1603_v38 = vadd.f32 %v1601_v6, %v2881_v43 }
 0xa6b   :  { %2281 = vmatmul.mubr.f32.vlgmr.msra.gmra.mrb[12].mxu1 %v1603_v38  ;;  %v2024_v38 = vld [vmem:[#allocation7 + $0x7] ss:$0 sm:$0xff] }
 0xa6c   :  { %2484 = vmatpush3.bf16.msra.mxu1 %v2481_v12 }
 0xa6d   :  { %2486 = vmatprep.subr.bf16.mxu1 %v2485_v15 }
 0xa70   :  { %2488 = vmatpush3.bf16.msra.mxu1 %v2485_v15 }
 0xa71   :  { %2490 = vmatprep.subr.bf16.mxu1 %v2489_v56 }
 0xa74   :  { %2492 = vmatpush3.bf16.msra.mxu1 %v2489_v56 }
 0xb3e   :  { %v2282_v5 = vpop.f32.mrb[12].mxu1 }
 0xb3f   :  { %v1697_v44 = vadd.f32 %v2282_v5, %v2022_v41  ;;  %v1691_v45 = vpop.f32.mrb[13].mxu1  ;;  %v1854_v5 = vld [vmem:[#allocation5 + $0x148] sm:$0xff] }
 0xb40   :  { %v1692_v0 = vadd.f32 %v2022_v41, %v1691_v45 }
 0xb41   :  { %v2896_v35 = vadd.f32 %v1697_v44, %v2742_v50  ;;  %v1746_v50 = vld [vmem:[#allocation5 + $0xe0] sm:$0xff]  ;;  %v1855_v44 = vld [vmem:[#allocation5 + $0x178] sm:$0xff] }
 0xb42   :  { %v2899_v31 = vadd.f32 %v1692_v0, %v2736_v26  ;;  %v1747_v26 = vld [vmem:[#allocation5 + $0x110] sm:$0xff]  ;;  %v2493_v45 = vpack.c.bf16 %v1855_v44, %v1854_v5  ;;  %v1856_v0 = vld [vmem:[#allocation5 + $0x1a8] sm:$0xff] }
 0xb43   :  { %1706 = vadd.xlane.f32.xlu1 %v2896_v35  ;;  %v1711_v43 = vmul.f32 %v2896_v35, %v2896_v35  ;;  %v2457_v47 = vpack.c.bf16 %v1747_v26, %v1746_v50  ;;  %v2505_v50 = vpack.c.bf16 %v1861_v51, %v1860_v49  ;;  %v1862_v26 = vld [vmem:[#allocation5 + $0x2c8] sm:$0xff] }
 0xb44   :  { %1704 = vadd.xlane.f32.xlu0 %v2899_v31  ;;  %v1710_v46 = vmul.f32 %v2899_v31, %v2899_v31  ;;  %2494 = vmatprep.subr.bf16.mxu1 %v2493_v45 }
 0xb45   :  { %2458 = vmatprep.subr.bf16.mxu0 %v2457_v47  ;;  %2496 = vmatpush3.bf16.msra.mxu1 %v2493_v45 }
 0xb46   :  { %2460 = vmatpush3.bf16.msra.mxu0 %v2457_v47  ;;  %v1863_v47 = vld [vmem:[#allocation5 + $0x2f8] sm:$0xff] }
 0xb47   :  { %1714 = vadd.xlane.f32.xlu1 %v1711_v43  ;;  %2462 = vmatprep.subr.bf16.mxu0 %v2461_v55  ;;  %v2509_v52 = vpack.c.bf16 %v1863_v47, %v1862_v26 }
 0xb48   :  { %1712 = vadd.xlane.f32.xlu0 %v1710_v46  ;;  %v1859_v46 = vld [vmem:[#allocation5 + $0x238] sm:$0xff] }
 0xb4a   :  { %2464 = vmatpush3.bf16.msra.mxu0 %v2461_v55 }
 0xb4b   :  { %2466 = vmatprep.subr.bf16.mxu0 %v2465_v61 }
 0xb4e   :  { %2468 = vmatpush3.bf16.msra.mxu0 %v2465_v61 }
 0xb4f   :  { %2470 = vmatprep.subr.bf16.mxu0 %v2469_v42 }
 0xb52   :  { %2472 = vmatpush3.bf16.msra.mxu0 %v2469_v42 }
 0xb53   :  { %2474 = vmatprep.subr.bf16.mxu0 %v2473_v3 }
 0xb56   :  { %2476 = vmatpush3.bf16.msra.mxu0 %v2473_v3 }
 0xb57   :  { %2478 = vmatprep.subr.bf16.mxu0 %v2477_v8 }
 0xb5a   :  { %2480 = vmatpush3.bf16.msra.mxu0 %v2477_v8 }
 0xbd0   :  { %v1707_v18 = vpop.xlane.xlu1 %1706 }
 0xbd1   :  { %v1709_v13 = vmul.f32 0.03125, %v1707_v18  ;;  %v1705_v19 = vpop.xlane.xlu0 %1704 }
 0xbd2   :  { %v1708_v20 = vmul.f32 0.03125, %v1705_v19 }
 0xbd3   :  { %v1719_v22 = vmul.f32 %v1709_v13, %v1709_v13  ;;  %v1723_v33 = vsub.f32 %v2896_v35, %v1709_v13  ;;  %v1857_v35 = vld [vmem:[#allocation5 + $0x1d8] sm:$0xff] }
 0xbd4   :  { %v1715_v21 = vpop.xlane.xlu1 %1714  ;;  %v1718_v25 = vmul.f32 %v1708_v20, %v1708_v20  ;;  %v1722_v57 = vsub.f32 %v2899_v31, %v1708_v20  ;;  %v2497_v43 = vpack.c.bf16 %v1857_v35, %v1856_v0  ;;  %v1858_v31 = vld [vmem:[#allocation5 + $0x208] sm:$0xff] }
 0xbd5   :  { %v1717_v23 = vmul.f32 0.03125, %v1715_v21  ;;  %v1713_v24 = vpop.xlane.xlu0 %1712  ;;  %v2501_v48 = vpack.c.bf16 %v1859_v46, %v1858_v31 }
 0xbd6   :  { %v1716_v27 = vmul.f32 0.03125, %v1713_v24  ;;  %2498 = vmatprep.subr.bf16.mxu1 %v2497_v43 }
 0xbd7   :  { %v1721_v28 = vsub.f32 %v1717_v23, %v1719_v22  ;;  %2500 = vmatpush3.bf16.msra.mxu1 %v2497_v43 }
 0xbd8   :  { %v1720_v29 = vsub.f32 %v1716_v27, %v1718_v25  ;;  %2502 = vmatprep.subr.bf16.mxu1 %v2501_v48 }
 0xbd9   :  { %v1725_v30 = vadd.f32 1e-12, %v1721_v28 }
 0xbda   :  { %v1724_v32 = vadd.f32 1e-12, %v1720_v29 }
 0xbdb   :  { %2556 = vrsqrt.f32 %v1725_v30  ;;  %2504 = vmatpush3.bf16.msra.mxu1 %v2501_v48 }
 0xbdc   :  { %2558 = vrsqrt.f32 %v1724_v32  ;;  %2506 = vmatprep.subr.bf16.mxu1 %v2505_v50 }
 0xbdf   :  { %2508 = vmatpush3.bf16.msra.mxu1 %v2505_v50 }
 0xbe0   :  { %2510 = vmatprep.subr.bf16.mxu1 %v2509_v52 }
 0xbe3   :  { %2512 = vmatpush3.bf16.msra.mxu1 %v2509_v52 }
 0xbe5   :  { %v2557_v34 = vpop.eup %2556 }
 0xbe6   :  { %v2559_v62 = vpop.eup %2558  ;;  %v1729_v6 = vmul.f32 %v2557_v34, %v1723_v33 }
 0xbe7   :  { %v1728_v37 = vmul.f32 %v2559_v62, %v1722_v57  ;;  %v2027_v62 = vld [vmem:[#allocation7 + $0x8] ss:$0 sm:$0xff] }
 0xbe8   :  { %v1735_v39 = vmul.f32 %v2023_v54, %v1729_v6 }
 0xbe9   :  { %v1734_v60 = vmul.f32 %v2023_v54, %v1728_v37 }
 0xbea   :  { %v1741_v41 = vadd.f32 %v2024_v38, %v1735_v39 }
 0xbeb   :  { %v1740_v40 = vadd.f32 %v2024_v38, %v1734_v60  ;;  %v2028_v38 = vld [vmem:[#allocation7 + $0x9] ss:$0 sm:$0xff] }
 0xbed   :  { %2315 = vmatprep.mubr.f32.mxu0 %v1740_v40 }
 0xbee   :  { %2316 = vmatmul.mubr.f32.vlgmr.msra.gmra.mrb[26].mxu0 %v1741_v41 }
 0xcc1   :  { %v2317_v55 = vpop.f32.mrb[26].mxu0 }
 0xcc2   :  { %v1835_v58 = vadd.f32 %v2317_v55, %v2025_v53  ;;  %v1829_v36 = vpop.f32.mrb[27].mxu0 }
 0xcc3   :  { %v1830_v59 = vadd.f32 %v2025_v53, %v1829_v36 }
 0xcc4   :  { %v1841_v61 = vmul.f32 0.70710677, %v1835_v58  ;;  %v1839_v7 = vmul.f32 0.5, %v1835_v58 }
 0xcc5   :  { %v1840_v63 = vmul.f32 0.70710677, %v1830_v59  ;;  %v1838_v3 = vmul.f32 0.5, %v1830_v59 }
 0xcc6   :  { %2560 = verf.f32 %v1841_v61 }
 0xcc7   :  { %2562 = verf.f32 %v1840_v63 }
 0xcd0   :  { %v2561_v42 = vpop.eup %2560 }
 0xcd1   :  { %v2563_v1 = vpop.eup %2562  ;;  %v1845_v2 = vadd.f32 1.0, %v2561_v42 }
 0xcd2   :  { %v1844_v4 = vadd.f32 1.0, %v2563_v1 }
 0xcd3   :  { %v1847_v9 = vmul.f32 %v1845_v2, %v1839_v7 }
 0xcd4   :  { %v1846_v8 = vmul.f32 %v1844_v4, %v1838_v3 }
 0xcd6   :  { %2350 = vmatprep.mubr.f32.mxu1 %v1846_v8 }
 0xcd7   :  { %2351 = vmatmul.mubr.f32.vlgmr.msra.gmra.mrb[14].mxu1 %v1847_v9 }
 0xdaa   :  { %v2352_v11 = vpop.f32.mrb[14].mxu1 }
 0xdab   :  { %v1941_v12 = vadd.f32 %v2352_v11, %v2026_v10  ;;  %v1935_v14 = vpop.f32.mrb[15].mxu1 }
 0xdac   :  { %v1936_v15 = vadd.f32 %v2026_v10, %v1935_v14 }
 0xdad   :  { %v1945_v16 = vadd.f32 %v1941_v12, %v1741_v41 }
 0xdae   :  { %v1944_v17 = vadd.f32 %v1936_v15, %v1740_v40 }
 0xdaf   :  { %1950 = vadd.xlane.f32.xlu1 %v1945_v16  ;;  %v1955_v56 = vmul.f32 %v1945_v16, %v1945_v16 }
 0xdb0   :  { %1948 = vadd.xlane.f32.xlu0 %v1944_v17  ;;  %v1954_v18 = vmul.f32 %v1944_v17, %v1944_v17 }
 0xdb3   :  { %1958 = vadd.xlane.f32.xlu1 %v1955_v56 }
 0xdb4   :  { %1956 = vadd.xlane.f32.xlu0 %v1954_v18 }
 0xe3c   :  { %v1951_v13 = vpop.xlane.xlu1 %1950 }
 0xe3d   :  { %v1953_v19 = vmul.f32 0.03125, %v1951_v13  ;;  %v1949_v20 = vpop.xlane.xlu0 %1948 }
 0xe3e   :  { %v1952_v21 = vmul.f32 0.03125, %v1949_v20 }
 0xe3f   :  { %v1963_v23 = vmul.f32 %v1953_v19, %v1953_v19  ;;  %v1967_v34 = vsub.f32 %v1945_v16, %v1953_v19 }
 0xe40   :  { %v1959_v22 = vpop.xlane.xlu1 %1958  ;;  %v1962_v27 = vmul.f32 %v1952_v21, %v1952_v21  ;;  %v1966_v54 = vsub.f32 %v1944_v17, %v1952_v21 }
 0xe41   :  { %v1961_v24 = vmul.f32 0.03125, %v1959_v22  ;;  %v1957_v25 = vpop.xlane.xlu0 %1956 }
 0xe42   :  { %v1960_v28 = vmul.f32 0.03125, %v1957_v25 }
 0xe43   :  { %v1965_v29 = vsub.f32 %v1961_v24, %v1963_v23 }
 0xe44   :  { %v1964_v30 = vsub.f32 %v1960_v28, %v1962_v27 }
 0xe45   :  { %v1969_v32 = vadd.f32 1e-12, %v1965_v29 }
 0xe46   :  { %v1968_v33 = vadd.f32 1e-12, %v1964_v30 }
 0xe47   :  { %2564 = vrsqrt.f32 %v1969_v32 }
 0xe48   :  { %2566 = vrsqrt.f32 %v1968_v33 }
 0xe51   :  { %v2565_v57 = vpop.eup %2564 }
 0xe52   :  { %v2567_v6 = vpop.eup %2566  ;;  %v1973_v37 = vmul.f32 %v2565_v57, %v1967_v34 }
 0xe53   :  { %v1972_v39 = vmul.f32 %v2567_v6, %v1966_v54 }
 0xe54   :  { %v1979_v60 = vmul.f32 %v2027_v62, %v1973_v37 }
 0xe55   :  { %v1978_v40 = vmul.f32 %v2027_v62, %v1972_v39 }
 0xe56   :  { %v1985_v41 = vadd.f32 %v2028_v38, %v1979_v60 }
 0xe57   :  { %v1984_v5 = vadd.f32 %v2028_v38, %v1978_v40 }
 0xe58   :  { %1987 = vst [vmem:[#allocation8 + $0x8] sm:$0xff] %v1985_v41 }
 0xe59   :  { %1986 = vst [vmem:[#allocation8] sm:$0xff] %v1984_v5 }
 0xe5a   :  { %2645 = shalt.err (!%p2642_p0)
}
 0xe5b   :  { %s2646_s27 = scalar_lea.hbm %s2927_s3, 256 }
 0xe5c   :  { %p2647_p1 = scmp.ne.s32.totalorder %s2927_s3, %s2646_s27  ;;  %p2650_p2 = scmp.lt.u32.totalorder %s2646_s27, %s2927_s3 }
 0xe5e   :  { %p2652_p3 = pnand %p2650_p2, %p2647_p1 }
 0xe60   :  { %2655 = shalt.err (!%p2652_p3)
}
 0xe61   :  { %1999 = dma.vmem_to_hbm [thread:$0]  %s1994_s23, 256, %s2927_s3, [#allocation4], %s2666_s1, %s2666_s1, %s2667_s9  }
 0xe62   :  { %2660 = dma.done.wait [#allocation4], 256  }
 0xe63   :  { %2661 = vsyncadd [#allocation4], 4294967040 }
 0xe64   :  { %2003 = vsyncpa [#allocation3], 1 }
 0xe65   :  { %2004 = vsyncpa [#allocation6], 1 }
 0xe66   :  { %2005 = vsyncpa [#allocation4], 1 }

</bundles_post_ra>
